<compile_context>
chip_gen: v7x
topology: tpu7x:2x2x1
jax: 0.10.0
libtpu: 0.0.40
codegen_flags: <defaults>
</compile_context>

<pallas_src>
import jax
import jax.numpy as jnp
from jax.experimental import pallas as pl
from jax.experimental.pallas import tpu as pltpu

EPS = 1e-5
LANE = 128  # TPU lane width: feature axes are padded to a multiple of this.
BF16 = jnp.bfloat16


def _round_up(n, m):
    return ((n + m - 1) // m) * m


def _pad2d(a, rows, cols):
    return jnp.pad(a, ((0, rows - a.shape[0]), (0, cols - a.shape[1])))


# ---------------------------------------------------------------------------
# Fused kernel
# ---------------------------------------------------------------------------
def _bn(x, gamma, beta):
    # BatchNorm1d train-mode forward, biased variance, centered two-pass stats
    # (avoids the E[x^2]-E[x]^2 cancellation).  All in f32 on the VPU/XLU.
    inv_n = 1.0 / x.shape[0]
    mean = jnp.sum(x, axis=0, keepdims=True) * inv_n
    d = x - mean
    var = jnp.sum(d * d, axis=0, keepdims=True) * inv_n
    return d * jax.lax.rsqrt(var + EPS) * gamma + beta


def make_fused_resgcn_kernel(num_conv_layers, num_fc_layers, residual):
    def kernel(x_ref, gf_ref, bf_ref, wf_ref, biasf_ref,
               adj_ref, cg_ref, cb_ref, cw_ref, cbias_ref,
               pool_ref, fg_ref, fb_ref, fw_ref, fbias_ref,
               gh_ref, bh_ref, o_ref):
        # --- stem: x = relu(lin_feat(bn_feat(x))) ---------------------------
        x = _bn(x_ref[...], gf_ref[...], bf_ref[...])
        x = jnp.dot(x.astype(BF16), wf_ref[...],
                    preferred_element_type=jnp.float32) + biasf_ref[...]
        x = jnp.maximum(x, 0.0)

        # --- GCN conv stack (small, statically unrolled; params stacked) ---
        adj = adj_ref[...]  # bf16, VMEM-resident at demo size
        for l in range(num_conv_layers):
            xb = _bn(x, cg_ref[l], cb_ref[l])
            xw = jnp.dot(xb.astype(BF16), cw_ref[l],
                         preferred_element_type=jnp.float32)
            h = jnp.dot(adj, xw.astype(BF16),
                        preferred_element_type=jnp.float32) + cbias_ref[l]
            h = jnp.maximum(h, 0.0)
            x = x + h if residual else h

        # --- global_add_pool as [B,N] @ [N,H], fused epilogue ---------------
        x = jnp.dot(pool_ref[...], x.astype(BF16),
                    preferred_element_type=jnp.float32)

        # --- fc stack --------------------------------------------------------
        for l in range(num_fc_layers):
            xb = _bn(x, fg_ref[l], fb_ref[l])
            x = jnp.dot(xb.astype(BF16), fw_ref[l],
                        preferred_element_type=jnp.float32) + fbias_ref[l]
            x = jnp.maximum(x, 0.0)

        # --- final bn_hidden -------------------------------------------------
        o_ref[...] = _bn(x, gh_ref[...], bh_ref[...])

    return kernel


# ---------------------------------------------------------------------------
# One-time parameter / graph preparation (hoisted out of the forward)
# ---------------------------------------------------------------------------
def prepare_params(params):
    """Pad to lane-dense layout, stack per-layer params, cast weights to bf16.

    Done ONCE, outside the per-forward path (the review's easiest wall-clock
    win).  BN gammas/betas and biases stay f32; weight matrices are bf16.
    """
    in_feats, h_feats = params["lin_feat_w"].shape
    FP = _round_up(in_feats, LANE)
    HP = _round_up(h_feats, LANE)

    convs, lins = params["convs"], params["lins"]
    prep = {
        "in_feats": in_feats, "h_feats": h_feats, "FP": FP, "HP": HP,
        "num_conv": len(convs), "num_fc": len(lins),
        "gf": _pad2d(params["bn_feat_g"], 1, FP),
        "bf": _pad2d(params["bn_feat_b"], 1, FP),
        "wf": _pad2d(params["lin_feat_w"], FP, HP).astype(BF16),
        "biasf": _pad2d(params["lin_feat_b"], 1, HP),
        "cg": jnp.stack([_pad2d(g, 1, HP) for (g, b, w, bias) in convs]),
        "cb": jnp.stack([_pad2d(b, 1, HP) for (g, b, w, bias) in convs]),
        "cw": jnp.stack([_pad2d(w, HP, HP) for (g, b, w, bias) in convs]).astype(BF16),
        "cbias": jnp.stack([_pad2d(bias, 1, HP) for (g, b, w, bias) in convs]),
        "fg": jnp.stack([_pad2d(g, 1, HP) for (g, b, w, bias) in lins]),
        "fb": jnp.stack([_pad2d(b, 1, HP) for (g, b, w, bias) in lins]),
        "fw": jnp.stack([_pad2d(w, HP, HP) for (g, b, w, bias) in lins]).astype(BF16),
        "fbias": jnp.stack([_pad2d(bias, 1, HP) for (g, b, w, bias) in lins]),
        "gh": _pad2d(params["bn_hidden_g"], 1, HP),
        "bh": _pad2d(params["bn_hidden_b"], 1, HP),
    }
    return prep


def prepare_graph(adj_norm, pool_mat):
    # Static per-batch tensors: cast once to bf16 (MXU-native operands).
    return adj_norm.astype(BF16), pool_mat.astype(BF16)


# ---------------------------------------------------------------------------
# Forward wrapper: pads only x, issues exactly one pallas_call
# ---------------------------------------------------------------------------
def res_gcn_forward(prep, x, adj_bf16, pool_bf16, residual):
    N, in_feats = x.shape
    h_feats, FP, HP = prep["h_feats"], prep["FP"], prep["HP"]
    B = pool_bf16.shape[0]
    num_conv, num_fc = prep["num_conv"], prep["num_fc"]

    xp = _pad2d(x, N, FP)  # only per-forward padding left

    args = (xp, prep["gf"], prep["bf"], prep["wf"], prep["biasf"],
            adj_bf16, prep["cg"], prep["cb"], prep["cw"], prep["cbias"],
            pool_bf16, prep["fg"], prep["fb"], prep["fw"], prep["fbias"],
            prep["gh"], prep["bh"])

    # Advisory cost estimate so XLA schedules surrounding ops around the call.
    flops = (2 * N * FP * HP
             + num_conv * (2 * N * HP * HP + 2 * N * N * HP)
             + 2 * B * N * HP
             + num_fc * 2 * B * HP * HP)
    transcendentals = FP + (num_conv + num_fc + 1) * HP  # rsqrt per BN channel
    bytes_accessed = sum(int(a.size) * a.dtype.itemsize for a in args) + B * HP * 4
    cost = pl.CostEstimate(flops=int(flops),
                           transcendentals=int(transcendentals),
                           bytes_accessed=int(bytes_accessed))

    kernel = make_fused_resgcn_kernel(num_conv, num_fc, residual)
    out_p = pl.pallas_call(
        kernel,
        out_shape=jax.ShapeDtypeStruct((B, HP), jnp.float32),
        in_specs=[pl.BlockSpec(memory_space=pltpu.MemorySpace.VMEM)] * len(args),
        out_specs=pl.BlockSpec(memory_space=pltpu.MemorySpace.VMEM),
        cost_estimate=cost,
        # NOTE: no vmem_limit_bytes override — at demo size the default scoped
        # limit is ample on v5e/v6e/v7x; at scale, budget per generation.
    )(*args)

    return out_p[:, :h_feats]


# ---------------------------------------------------------------------------
# Pure-JAX reference (for self-checking the fused kernel).
# match_kernel_precision=True mirrors the kernel's bf16-operand / f32-acc
# matmuls so the check validates the kernel implementation rather than bf16
# rounding (BN over 2 pooled samples amplifies bf16-vs-f32 drift).
# ---------------------------------------------------------------------------
def ref_forward(params, x, adj_norm, pool_mat, residual,
                match_kernel_precision=True):
    def mm(a, b):
        if match_kernel_precision:
            return jnp.dot(a.astype(BF16), b.astype(BF16),
                           preferred_element_type=jnp.float32)
        return jnp.dot(a, b, precision=jax.lax.Precision.HIGHEST)

    def bn(v, g, b):
        m = jnp.mean(v, axis=0, keepdims=True)
        d = v - m
        var = jnp.mean(d * d, axis=0, keepdims=True)
        return d * jax.lax.rsqrt(var + EPS) * g + b

    x = bn(x, params["bn_feat_g"], params["bn_feat_b"])
    x = jnp.maximum(mm(x, params["lin_feat_w"]) + params["lin_feat_b"], 0.0)
    for (g, b, w, bias) in params["convs"]:
        xb = bn(x, g, b)
        h = jnp.maximum(mm(adj_norm, mm(xb, w)) + bias, 0.0)
        x = x + h if residual else h
    x = mm(pool_mat, x)
    for (g, b, w, bias) in params["lins"]:
        xb = bn(x, g, b)
        x = jnp.maximum(mm(xb, w) + bias, 0.0)
    return bn(x, params["bn_hidden_g"], params["bn_hidden_b"])


# ---------------------------------------------------------------------------
# Deterministic parameter init + graph construction (plain JAX glue)
# ---------------------------------------------------------------------------
def init_params(key, in_feats, h_feats, num_conv_layers, num_fc_layers):
    ks = iter(jax.random.split(key, 8 + 4 * (num_conv_layers + num_fc_layers)))

    def dense(fan_in, fan_out):
        lim = 1.0 / jnp.sqrt(jnp.float32(fan_in))
        w = jax.random.uniform(next(ks), (fan_in, fan_out), jnp.float32, -lim, lim)
        b = jax.random.uniform(next(ks), (1, fan_out), jnp.float32, -lim, lim)
        return w, b

    def bn(c):
        g = 1.0 + 0.1 * jax.random.normal(next(ks), (1, c), jnp.float32)
        b = 0.1 * jax.random.normal(next(ks), (1, c), jnp.float32)
        return g, b

    p = {}
    p["bn_feat_g"], p["bn_feat_b"] = bn(in_feats)
    p["lin_feat_w"], p["lin_feat_b"] = dense(in_feats, h_feats)
    p["convs"] = []
    for _ in range(num_conv_layers):
        g, b = bn(h_feats)
        w, bias = dense(h_feats, h_feats)
        p["convs"].append((g, b, w, bias))
    p["lins"] = []
    for _ in range(num_fc_layers):
        g, b = bn(h_feats)
        w, bias = dense(h_feats, h_feats)
        p["lins"].append((g, b, w, bias))
    p["bn_hidden_g"], p["bn_hidden_b"] = bn(h_feats)
    return p


def build_graph(num_graphs, nodes_per_graph):
    N = num_graphs * nodes_per_graph
    src, dst = [], []
    for g in range(num_graphs):
        base = g * nodes_per_graph
        for i in range(nodes_per_graph - 1):  # bidirectional chain per graph
            src += [base + i, base + i + 1]
            dst += [base + i + 1, base + i]
    A = jnp.zeros((N, N), jnp.float32).at[jnp.array(dst), jnp.array(src)].set(1.0)
    A = A + jnp.eye(N, dtype=jnp.float32)            # add self-loops
    deg = jnp.sum(A, axis=1)
    dinv = jax.lax.rsqrt(deg)
    adj_norm = dinv[:, None] * A * dinv[None, :]     # D^-1/2 (A+I) D^-1/2

    batch = jnp.repeat(jnp.arange(num_graphs), nodes_per_graph)
    # global_pool == 'sum'  -> one-hot assignment matrix [B, N]
    pool_mat = (batch[None, :] == jnp.arange(num_graphs)[:, None]).astype(jnp.float32)
    return adj_norm, pool_mat


# ---------------------------------------------------------------------------
if __name__ == "__main__":
    key = jax.random.PRNGKey(0)
    k_param, k_x = jax.random.split(key)

    in_feats, h_feats = 8, 32
    num_conv_layers, num_fc_layers = 2, 2
    residual = True
    num_graphs, nodes_per_graph = 2, 8
    N = num_graphs * nodes_per_graph

    params = init_params(k_param, in_feats, h_feats, num_conv_layers, num_fc_layers)
    x = jax.random.normal(k_x, (N, in_feats), jnp.float32)
    adj_norm, pool_mat = build_graph(num_graphs, nodes_per_graph)

    # One-time prep (padding / stacking / bf16 casts hoisted out of forward).
    prep = prepare_params(params)
    adj_bf16, pool_bf16 = prepare_graph(adj_norm, pool_mat)

    fwd = jax.jit(lambda xv: res_gcn_forward(prep, xv, adj_bf16, pool_bf16, residual))
    out = jax.block_until_ready(fwd(x))

    assert out.shape == (num_graphs, h_feats)
    assert bool(jnp.all(jnp.isfinite(out)))

    # Check against a precision-matched pure-JAX reference (same bf16-operand
    # matmul recipe); validates the fused kernel's implementation exactly.
    ref = ref_forward(params, x, adj_norm, pool_mat, residual,
                      match_kernel_precision=True)
    max_diff = float(jnp.max(jnp.abs(out - ref)))
    assert bool(jnp.allclose(out, ref, atol=2e-2, rtol=2e-2)), f"max abs diff {max_diff}"

    print("KERNEL_OK")
</pallas_src>

<mosaic_0001>
module attributes {stable_mosaic.version = 11 : i64} {
  func.func @kernel(%arg0: memref<16x128xf32, #tpu.memory_space<vmem>>, %arg1: memref<1x128xf32, #tpu.memory_space<vmem>>, %arg2: memref<1x128xf32, #tpu.memory_space<vmem>>, %arg3: memref<128x128xbf16, #tpu.memory_space<vmem>>, %arg4: memref<1x128xf32, #tpu.memory_space<vmem>>, %arg5: memref<16x16xbf16, #tpu.memory_space<vmem>>, %arg6: memref<2x1x128xf32, #tpu.memory_space<vmem>>, %arg7: memref<2x1x128xf32, #tpu.memory_space<vmem>>, %arg8: memref<2x128x128xbf16, #tpu.memory_space<vmem>>, %arg9: memref<2x1x128xf32, #tpu.memory_space<vmem>>, %arg10: memref<2x16xbf16, #tpu.memory_space<vmem>>, %arg11: memref<2x1x128xf32, #tpu.memory_space<vmem>>, %arg12: memref<2x1x128xf32, #tpu.memory_space<vmem>>, %arg13: memref<2x128x128xbf16, #tpu.memory_space<vmem>>, %arg14: memref<2x1x128xf32, #tpu.memory_space<vmem>>, %arg15: memref<1x128xf32, #tpu.memory_space<vmem>>, %arg16: memref<1x128xf32, #tpu.memory_space<vmem>>, %arg17: memref<2x128xf32, #tpu.memory_space<vmem>>) attributes {dimension_semantics = [], scalar_prefetch = 0 : i64, scratch_operands = 0 : i64, tpu.core_type = #tpu.core_type<tc>} {
    %c0 = arith.constant 0 : index
    %c0_0 = arith.constant 0 : index
    %0 = vector.load %arg0[%c0, %c0_0] : memref<16x128xf32, #tpu.memory_space<vmem>>, vector<16x128xf32>
    %c0_1 = arith.constant 0 : index
    %c0_2 = arith.constant 0 : index
    %1 = vector.load %arg1[%c0_1, %c0_2] : memref<1x128xf32, #tpu.memory_space<vmem>>, vector<1x128xf32>
    %c0_3 = arith.constant 0 : index
    %c0_4 = arith.constant 0 : index
    %2 = vector.load %arg2[%c0_3, %c0_4] : memref<1x128xf32, #tpu.memory_space<vmem>>, vector<1x128xf32>
    %cst = arith.constant dense<0.000000e+00> : vector<128xf32>
    %3 = vector.multi_reduction <add>, %0, %cst [0] : vector<16x128xf32> to vector<128xf32>
    %4 = vector.shape_cast %3 : vector<128xf32> to vector<1x128xf32>
    %cst_5 = arith.constant 6.250000e-02 : f32
    %5 = vector.broadcast %cst_5 : f32 to vector<1x128xf32>
    %6 = arith.mulf %4, %5 : vector<1x128xf32>
    %7 = vector.broadcast %6 : vector<1x128xf32> to vector<16x128xf32>
    %8 = arith.subf %0, %7 : vector<16x128xf32>
    %9 = arith.mulf %8, %8 : vector<16x128xf32>
    %cst_6 = arith.constant dense<0.000000e+00> : vector<128xf32>
    %10 = vector.multi_reduction <add>, %9, %cst_6 [0] : vector<16x128xf32> to vector<128xf32>
    %11 = vector.shape_cast %10 : vector<128xf32> to vector<1x128xf32>
    %cst_7 = arith.constant 6.250000e-02 : f32
    %12 = vector.broadcast %cst_7 : f32 to vector<1x128xf32>
    %13 = arith.mulf %11, %12 : vector<1x128xf32>
    %cst_8 = arith.constant 9.99999974E-6 : f32
    %14 = vector.broadcast %cst_8 : f32 to vector<1x128xf32>
    %15 = arith.addf %13, %14 : vector<1x128xf32>
    %16 = math.rsqrt %15 : vector<1x128xf32>
    %17 = vector.broadcast %16 : vector<1x128xf32> to vector<16x128xf32>
    %18 = arith.mulf %8, %17 : vector<16x128xf32>
    %19 = vector.broadcast %1 : vector<1x128xf32> to vector<16x128xf32>
    %20 = arith.mulf %18, %19 : vector<16x128xf32>
    %21 = vector.broadcast %2 : vector<1x128xf32> to vector<16x128xf32>
    %22 = arith.addf %20, %21 : vector<16x128xf32>
    %23 = arith.truncf %22 : vector<16x128xf32> to vector<16x128xbf16>
    %c0_9 = arith.constant 0 : index
    %c0_10 = arith.constant 0 : index
    %24 = vector.load %arg3[%c0_9, %c0_10] : memref<128x128xbf16, #tpu.memory_space<vmem>>, vector<128x128xbf16>
    %cst_11 = arith.constant dense<0.000000e+00> : vector<16x128xf32>
    %25 = tpu.matmul %23, %24, %cst_11 {dimension_numbers = #tpu.dot_dimension_numbers<[1], [0], [0], [1], [0, 0, 1, 1], [], []>} : vector<16x128xbf16>, vector<128x128xbf16>, vector<16x128xf32> -> vector<16x128xf32>
    %c0_12 = arith.constant 0 : index
    %c0_13 = arith.constant 0 : index
    %26 = vector.load %arg4[%c0_12, %c0_13] : memref<1x128xf32, #tpu.memory_space<vmem>>, vector<1x128xf32>
    %27 = vector.broadcast %26 : vector<1x128xf32> to vector<16x128xf32>
    %28 = arith.addf %25, %27 : vector<16x128xf32>
    %cst_14 = arith.constant 0.000000e+00 : f32
    %29 = vector.broadcast %cst_14 : f32 to vector<16x128xf32>
    %30 = arith.maximumf %28, %29 : vector<16x128xf32>
    %c0_15 = arith.constant 0 : index
    %c0_16 = arith.constant 0 : index
    %31 = vector.load %arg5[%c0_15, %c0_16] : memref<16x16xbf16, #tpu.memory_space<vmem>>, vector<16x16xbf16>
    %c0_17 = arith.constant 0 : index
    %c0_18 = arith.constant 0 : index
    %c0_19 = arith.constant 0 : index
    %32 = vector.load %arg6[%c0_17, %c0_18, %c0_19] : memref<2x1x128xf32, #tpu.memory_space<vmem>>, vector<1x1x128xf32>
    %33 = vector.shape_cast %32 : vector<1x1x128xf32> to vector<1x128xf32>
    %c0_20 = arith.constant 0 : index
    %c0_21 = arith.constant 0 : index
    %c0_22 = arith.constant 0 : index
    %34 = vector.load %arg7[%c0_20, %c0_21, %c0_22] : memref<2x1x128xf32, #tpu.memory_space<vmem>>, vector<1x1x128xf32>
    %35 = vector.shape_cast %34 : vector<1x1x128xf32> to vector<1x128xf32>
    %cst_23 = arith.constant dense<0.000000e+00> : vector<128xf32>
    %36 = vector.multi_reduction <add>, %30, %cst_23 [0] : vector<16x128xf32> to vector<128xf32>
    %37 = vector.shape_cast %36 : vector<128xf32> to vector<1x128xf32>
    %cst_24 = arith.constant 6.250000e-02 : f32
    %38 = vector.broadcast %cst_24 : f32 to vector<1x128xf32>
    %39 = arith.mulf %37, %38 : vector<1x128xf32>
    %40 = vector.broadcast %39 : vector<1x128xf32> to vector<16x128xf32>
    %41 = arith.subf %30, %40 : vector<16x128xf32>
    %42 = arith.mulf %41, %41 : vector<16x128xf32>
    %cst_25 = arith.constant dense<0.000000e+00> : vector<128xf32>
    %43 = vector.multi_reduction <add>, %42, %cst_25 [0] : vector<16x128xf32> to vector<128xf32>
    %44 = vector.shape_cast %43 : vector<128xf32> to vector<1x128xf32>
    %cst_26 = arith.constant 6.250000e-02 : f32
    %45 = vector.broadcast %cst_26 : f32 to vector<1x128xf32>
    %46 = arith.mulf %44, %45 : vector<1x128xf32>
    %cst_27 = arith.constant 9.99999974E-6 : f32
    %47 = vector.broadcast %cst_27 : f32 to vector<1x128xf32>
    %48 = arith.addf %46, %47 : vector<1x128xf32>
    %49 = math.rsqrt %48 : vector<1x128xf32>
    %50 = vector.broadcast %49 : vector<1x128xf32> to vector<16x128xf32>
    %51 = arith.mulf %41, %50 : vector<16x128xf32>
    %52 = vector.broadcast %33 : vector<1x128xf32> to vector<16x128xf32>
    %53 = arith.mulf %51, %52 : vector<16x128xf32>
    %54 = vector.broadcast %35 : vector<1x128xf32> to vector<16x128xf32>
    %55 = arith.addf %53, %54 : vector<16x128xf32>
    %56 = arith.truncf %55 : vector<16x128xf32> to vector<16x128xbf16>
    %c0_28 = arith.constant 0 : index
    %c0_29 = arith.constant 0 : index
    %c0_30 = arith.constant 0 : index
    %57 = vector.load %arg8[%c0_28, %c0_29, %c0_30] : memref<2x128x128xbf16, #tpu.memory_space<vmem>>, vector<1x128x128xbf16>
    %58 = vector.shape_cast %57 : vector<1x128x128xbf16> to vector<128x128xbf16>
    %cst_31 = arith.constant dense<0.000000e+00> : vector<16x128xf32>
    %59 = tpu.matmul %56, %58, %cst_31 {dimension_numbers = #tpu.dot_dimension_numbers<[1], [0], [0], [1], [0, 0, 1, 1], [], []>} : vector<16x128xbf16>, vector<128x128xbf16>, vector<16x128xf32> -> vector<16x128xf32>
    %60 = arith.truncf %59 : vector<16x128xf32> to vector<16x128xbf16>
    %cst_32 = arith.constant dense<0.000000e+00> : vector<16x128xf32>
    %61 = tpu.matmul %31, %60, %cst_32 {dimension_numbers = #tpu.dot_dimension_numbers<[1], [0], [0], [1], [0, 0, 1, 1], [], []>} : vector<16x16xbf16>, vector<16x128xbf16>, vector<16x128xf32> -> vector<16x128xf32>
    %c0_33 = arith.constant 0 : index
    %c0_34 = arith.constant 0 : index
    %c0_35 = arith.constant 0 : index
    %62 = vector.load %arg9[%c0_33, %c0_34, %c0_35] : memref<2x1x128xf32, #tpu.memory_space<vmem>>, vector<1x1x128xf32>
    %63 = vector.shape_cast %62 : vector<1x1x128xf32> to vector<1x128xf32>
    %64 = vector.broadcast %63 : vector<1x128xf32> to vector<16x128xf32>
    %65 = arith.addf %61, %64 : vector<16x128xf32>
    %cst_36 = arith.constant 0.000000e+00 : f32
    %66 = vector.broadcast %cst_36 : f32 to vector<16x128xf32>
    %67 = arith.maximumf %65, %66 : vector<16x128xf32>
    %68 = arith.addf %30, %67 : vector<16x128xf32>
    %c1 = arith.constant 1 : index
    %c0_37 = arith.constant 0 : index
    %c0_38 = arith.constant 0 : index
    %69 = vector.load %arg6[%c1, %c0_37, %c0_38] : memref<2x1x128xf32, #tpu.memory_space<vmem>>, vector<1x1x128xf32>
    %70 = vector.shape_cast %69 : vector<1x1x128xf32> to vector<1x128xf32>
    %c1_39 = arith.constant 1 : index
    %c0_40 = arith.constant 0 : index
    %c0_41 = arith.constant 0 : index
    %71 = vector.load %arg7[%c1_39, %c0_40, %c0_41] : memref<2x1x128xf32, #tpu.memory_space<vmem>>, vector<1x1x128xf32>
    %72 = vector.shape_cast %71 : vector<1x1x128xf32> to vector<1x128xf32>
    %cst_42 = arith.constant dense<0.000000e+00> : vector<128xf32>
    %73 = vector.multi_reduction <add>, %68, %cst_42 [0] : vector<16x128xf32> to vector<128xf32>
    %74 = vector.shape_cast %73 : vector<128xf32> to vector<1x128xf32>
    %cst_43 = arith.constant 6.250000e-02 : f32
    %75 = vector.broadcast %cst_43 : f32 to vector<1x128xf32>
    %76 = arith.mulf %74, %75 : vector<1x128xf32>
    %77 = vector.broadcast %76 : vector<1x128xf32> to vector<16x128xf32>
    %78 = arith.subf %68, %77 : vector<16x128xf32>
    %79 = arith.mulf %78, %78 : vector<16x128xf32>
    %cst_44 = arith.constant dense<0.000000e+00> : vector<128xf32>
    %80 = vector.multi_reduction <add>, %79, %cst_44 [0] : vector<16x128xf32> to vector<128xf32>
    %81 = vector.shape_cast %80 : vector<128xf32> to vector<1x128xf32>
    %cst_45 = arith.constant 6.250000e-02 : f32
    %82 = vector.broadcast %cst_45 : f32 to vector<1x128xf32>
    %83 = arith.mulf %81, %82 : vector<1x128xf32>
    %cst_46 = arith.constant 9.99999974E-6 : f32
    %84 = vector.broadcast %cst_46 : f32 to vector<1x128xf32>
    %85 = arith.addf %83, %84 : vector<1x128xf32>
    %86 = math.rsqrt %85 : vector<1x128xf32>
    %87 = vector.broadcast %86 : vector<1x128xf32> to vector<16x128xf32>
    %88 = arith.mulf %78, %87 : vector<16x128xf32>
    %89 = vector.broadcast %70 : vector<1x128xf32> to vector<16x128xf32>
    %90 = arith.mulf %88, %89 : vector<16x128xf32>
    %91 = vector.broadcast %72 : vector<1x128xf32> to vector<16x128xf32>
    %92 = arith.addf %90, %91 : vector<16x128xf32>
    %93 = arith.truncf %92 : vector<16x128xf32> to vector<16x128xbf16>
    %c1_47 = arith.constant 1 : index
    %c0_48 = arith.constant 0 : index
    %c0_49 = arith.constant 0 : index
    %94 = vector.load %arg8[%c1_47, %c0_48, %c0_49] : memref<2x128x128xbf16, #tpu.memory_space<vmem>>, vector<1x128x128xbf16>
    %95 = vector.shape_cast %94 : vector<1x128x128xbf16> to vector<128x128xbf16>
    %cst_50 = arith.constant dense<0.000000e+00> : vector<16x128xf32>
    %96 = tpu.matmul %93, %95, %cst_50 {dimension_numbers = #tpu.dot_dimension_numbers<[1], [0], [0], [1], [0, 0, 1, 1], [], []>} : vector<16x128xbf16>, vector<128x128xbf16>, vector<16x128xf32> -> vector<16x128xf32>
    %97 = arith.truncf %96 : vector<16x128xf32> to vector<16x128xbf16>
    %cst_51 = arith.constant dense<0.000000e+00> : vector<16x128xf32>
    %98 = tpu.matmul %31, %97, %cst_51 {dimension_numbers = #tpu.dot_dimension_numbers<[1], [0], [0], [1], [0, 0, 1, 1], [], []>} : vector<16x16xbf16>, vector<16x128xbf16>, vector<16x128xf32> -> vector<16x128xf32>
    %c1_52 = arith.constant 1 : index
    %c0_53 = arith.constant 0 : index
    %c0_54 = arith.constant 0 : index
    %99 = vector.load %arg9[%c1_52, %c0_53, %c0_54] : memref<2x1x128xf32, #tpu.memory_space<vmem>>, vector<1x1x128xf32>
    %100 = vector.shape_cast %99 : vector<1x1x128xf32> to vector<1x128xf32>
    %101 = vector.broadcast %100 : vector<1x128xf32> to vector<16x128xf32>
    %102 = arith.addf %98, %101 : vector<16x128xf32>
    %cst_55 = arith.constant 0.000000e+00 : f32
    %103 = vector.broadcast %cst_55 : f32 to vector<16x128xf32>
    %104 = arith.maximumf %102, %103 : vector<16x128xf32>
    %105 = arith.addf %68, %104 : vector<16x128xf32>
    %c0_56 = arith.constant 0 : index
    %c0_57 = arith.constant 0 : index
    %106 = vector.load %arg10[%c0_56, %c0_57] : memref<2x16xbf16, #tpu.memory_space<vmem>>, vector<2x16xbf16>
    %107 = arith.truncf %105 : vector<16x128xf32> to vector<16x128xbf16>
    %cst_58 = arith.constant dense<0.000000e+00> : vector<2x128xf32>
    %108 = tpu.matmul %106, %107, %cst_58 {dimension_numbers = #tpu.dot_dimension_numbers<[1], [0], [0], [1], [0, 0, 1, 1], [], []>} : vector<2x16xbf16>, vector<16x128xbf16>, vector<2x128xf32> -> vector<2x128xf32>
    %c0_59 = arith.constant 0 : index
    %c0_60 = arith.constant 0 : index
    %c0_61 = arith.constant 0 : index
    %109 = vector.load %arg11[%c0_59, %c0_60, %c0_61] : memref<2x1x128xf32, #tpu.memory_space<vmem>>, vector<1x1x128xf32>
    %110 = vector.shape_cast %109 : vector<1x1x128xf32> to vector<1x128xf32>
    %c0_62 = arith.constant 0 : index
    %c0_63 = arith.constant 0 : index
    %c0_64 = arith.constant 0 : index
    %111 = vector.load %arg12[%c0_62, %c0_63, %c0_64] : memref<2x1x128xf32, #tpu.memory_space<vmem>>, vector<1x1x128xf32>
    %112 = vector.shape_cast %111 : vector<1x1x128xf32> to vector<1x128xf32>
    %cst_65 = arith.constant dense<0.000000e+00> : vector<128xf32>
    %113 = vector.multi_reduction <add>, %108, %cst_65 [0] : vector<2x128xf32> to vector<128xf32>
    %114 = vector.shape_cast %113 : vector<128xf32> to vector<1x128xf32>
    %cst_66 = arith.constant 5.000000e-01 : f32
    %115 = vector.broadcast %cst_66 : f32 to vector<1x128xf32>
    %116 = arith.mulf %114, %115 : vector<1x128xf32>
    %117 = vector.broadcast %116 : vector<1x128xf32> to vector<2x128xf32>
    %118 = arith.subf %108, %117 : vector<2x128xf32>
    %119 = arith.mulf %118, %118 : vector<2x128xf32>
    %cst_67 = arith.constant dense<0.000000e+00> : vector<128xf32>
    %120 = vector.multi_reduction <add>, %119, %cst_67 [0] : vector<2x128xf32> to vector<128xf32>
    %121 = vector.shape_cast %120 : vector<128xf32> to vector<1x128xf32>
    %cst_68 = arith.constant 5.000000e-01 : f32
    %122 = vector.broadcast %cst_68 : f32 to vector<1x128xf32>
    %123 = arith.mulf %121, %122 : vector<1x128xf32>
    %cst_69 = arith.constant 9.99999974E-6 : f32
    %124 = vector.broadcast %cst_69 : f32 to vector<1x128xf32>
    %125 = arith.addf %123, %124 : vector<1x128xf32>
    %126 = math.rsqrt %125 : vector<1x128xf32>
    %127 = vector.broadcast %126 : vector<1x128xf32> to vector<2x128xf32>
    %128 = arith.mulf %118, %127 : vector<2x128xf32>
    %129 = vector.broadcast %110 : vector<1x128xf32> to vector<2x128xf32>
    %130 = arith.mulf %128, %129 : vector<2x128xf32>
    %131 = vector.broadcast %112 : vector<1x128xf32> to vector<2x128xf32>
    %132 = arith.addf %130, %131 : vector<2x128xf32>
    %133 = arith.truncf %132 : vector<2x128xf32> to vector<2x128xbf16>
    %c0_70 = arith.constant 0 : index
    %c0_71 = arith.constant 0 : index
    %c0_72 = arith.constant 0 : index
    %134 = vector.load %arg13[%c0_70, %c0_71, %c0_72] : memref<2x128x128xbf16, #tpu.memory_space<vmem>>, vector<1x128x128xbf16>
    %135 = vector.shape_cast %134 : vector<1x128x128xbf16> to vector<128x128xbf16>
    %cst_73 = arith.constant dense<0.000000e+00> : vector<2x128xf32>
    %136 = tpu.matmul %133, %135, %cst_73 {dimension_numbers = #tpu.dot_dimension_numbers<[1], [0], [0], [1], [0, 0, 1, 1], [], []>} : vector<2x128xbf16>, vector<128x128xbf16>, vector<2x128xf32> -> vector<2x128xf32>
    %c0_74 = arith.constant 0 : index
    %c0_75 = arith.constant 0 : index
    %c0_76 = arith.constant 0 : index
    %137 = vector.load %arg14[%c0_74, %c0_75, %c0_76] : memref<2x1x128xf32, #tpu.memory_space<vmem>>, vector<1x1x128xf32>
    %138 = vector.shape_cast %137 : vector<1x1x128xf32> to vector<1x128xf32>
    %139 = vector.broadcast %138 : vector<1x128xf32> to vector<2x128xf32>
    %140 = arith.addf %136, %139 : vector<2x128xf32>
    %cst_77 = arith.constant 0.000000e+00 : f32
    %141 = vector.broadcast %cst_77 : f32 to vector<2x128xf32>
    %142 = arith.maximumf %140, %141 : vector<2x128xf32>
    %c1_78 = arith.constant 1 : index
    %c0_79 = arith.constant 0 : index
    %c0_80 = arith.constant 0 : index
    %143 = vector.load %arg11[%c1_78, %c0_79, %c0_80] : memref<2x1x128xf32, #tpu.memory_space<vmem>>, vector<1x1x128xf32>
    %144 = vector.shape_cast %143 : vector<1x1x128xf32> to vector<1x128xf32>
    %c1_81 = arith.constant 1 : index
    %c0_82 = arith.constant 0 : index
    %c0_83 = arith.constant 0 : index
    %145 = vector.load %arg12[%c1_81, %c0_82, %c0_83] : memref<2x1x128xf32, #tpu.memory_space<vmem>>, vector<1x1x128xf32>
    %146 = vector.shape_cast %145 : vector<1x1x128xf32> to vector<1x128xf32>
    %cst_84 = arith.constant dense<0.000000e+00> : vector<128xf32>
    %147 = vector.multi_reduction <add>, %142, %cst_84 [0] : vector<2x128xf32> to vector<128xf32>
    %148 = vector.shape_cast %147 : vector<128xf32> to vector<1x128xf32>
    %cst_85 = arith.constant 5.000000e-01 : f32
    %149 = vector.broadcast %cst_85 : f32 to vector<1x128xf32>
    %150 = arith.mulf %148, %149 : vector<1x128xf32>
    %151 = vector.broadcast %150 : vector<1x128xf32> to vector<2x128xf32>
    %152 = arith.subf %142, %151 : vector<2x128xf32>
    %153 = arith.mulf %152, %152 : vector<2x128xf32>
    %cst_86 = arith.constant dense<0.000000e+00> : vector<128xf32>
    %154 = vector.multi_reduction <add>, %153, %cst_86 [0] : vector<2x128xf32> to vector<128xf32>
    %155 = vector.shape_cast %154 : vector<128xf32> to vector<1x128xf32>
    %cst_87 = arith.constant 5.000000e-01 : f32
    %156 = vector.broadcast %cst_87 : f32 to vector<1x128xf32>
    %157 = arith.mulf %155, %156 : vector<1x128xf32>
    %cst_88 = arith.constant 9.99999974E-6 : f32
    %158 = vector.broadcast %cst_88 : f32 to vector<1x128xf32>
    %159 = arith.addf %157, %158 : vector<1x128xf32>
    %160 = math.rsqrt %159 : vector<1x128xf32>
    %161 = vector.broadcast %160 : vector<1x128xf32> to vector<2x128xf32>
    %162 = arith.mulf %152, %161 : vector<2x128xf32>
    %163 = vector.broadcast %144 : vector<1x128xf32> to vector<2x128xf32>
    %164 = arith.mulf %162, %163 : vector<2x128xf32>
    %165 = vector.broadcast %146 : vector<1x128xf32> to vector<2x128xf32>
    %166 = arith.addf %164, %165 : vector<2x128xf32>
    %167 = arith.truncf %166 : vector<2x128xf32> to vector<2x128xbf16>
    %c1_89 = arith.constant 1 : index
    %c0_90 = arith.constant 0 : index
    %c0_91 = arith.constant 0 : index
    %168 = vector.load %arg13[%c1_89, %c0_90, %c0_91] : memref<2x128x128xbf16, #tpu.memory_space<vmem>>, vector<1x128x128xbf16>
    %169 = vector.shape_cast %168 : vector<1x128x128xbf16> to vector<128x128xbf16>
    %cst_92 = arith.constant dense<0.000000e+00> : vector<2x128xf32>
    %170 = tpu.matmul %167, %169, %cst_92 {dimension_numbers = #tpu.dot_dimension_numbers<[1], [0], [0], [1], [0, 0, 1, 1], [], []>} : vector<2x128xbf16>, vector<128x128xbf16>, vector<2x128xf32> -> vector<2x128xf32>
    %c1_93 = arith.constant 1 : index
    %c0_94 = arith.constant 0 : index
    %c0_95 = arith.constant 0 : index
    %171 = vector.load %arg14[%c1_93, %c0_94, %c0_95] : memref<2x1x128xf32, #tpu.memory_space<vmem>>, vector<1x1x128xf32>
    %172 = vector.shape_cast %171 : vector<1x1x128xf32> to vector<1x128xf32>
    %173 = vector.broadcast %172 : vector<1x128xf32> to vector<2x128xf32>
    %174 = arith.addf %170, %173 : vector<2x128xf32>
    %cst_96 = arith.constant 0.000000e+00 : f32
    %175 = vector.broadcast %cst_96 : f32 to vector<2x128xf32>
    %176 = arith.maximumf %174, %175 : vector<2x128xf32>
    %c0_97 = arith.constant 0 : index
    %c0_98 = arith.constant 0 : index
    %177 = vector.load %arg15[%c0_97, %c0_98] : memref<1x128xf32, #tpu.memory_space<vmem>>, vector<1x128xf32>
    %c0_99 = arith.constant 0 : index
    %c0_100 = arith.constant 0 : index
    %178 = vector.load %arg16[%c0_99, %c0_100] : memref<1x128xf32, #tpu.memory_space<vmem>>, vector<1x128xf32>
    %cst_101 = arith.constant dense<0.000000e+00> : vector<128xf32>
    %179 = vector.multi_reduction <add>, %176, %cst_101 [0] : vector<2x128xf32> to vector<128xf32>
    %180 = vector.shape_cast %179 : vector<128xf32> to vector<1x128xf32>
    %cst_102 = arith.constant 5.000000e-01 : f32
    %181 = vector.broadcast %cst_102 : f32 to vector<1x128xf32>
    %182 = arith.mulf %180, %181 : vector<1x128xf32>
    %183 = vector.broadcast %182 : vector<1x128xf32> to vector<2x128xf32>
    %184 = arith.subf %176, %183 : vector<2x128xf32>
    %185 = arith.mulf %184, %184 : vector<2x128xf32>
    %cst_103 = arith.constant dense<0.000000e+00> : vector<128xf32>
    %186 = vector.multi_reduction <add>, %185, %cst_103 [0] : vector<2x128xf32> to vector<128xf32>
    %187 = vector.shape_cast %186 : vector<128xf32> to vector<1x128xf32>
    %cst_104 = arith.constant 5.000000e-01 : f32
    %188 = vector.broadcast %cst_104 : f32 to vector<1x128xf32>
    %189 = arith.mulf %187, %188 : vector<1x128xf32>
    %cst_105 = arith.constant 9.99999974E-6 : f32
    %190 = vector.broadcast %cst_105 : f32 to vector<1x128xf32>
    %191 = arith.addf %189, %190 : vector<1x128xf32>
    %192 = math.rsqrt %191 : vector<1x128xf32>
    %193 = vector.broadcast %192 : vector<1x128xf32> to vector<2x128xf32>
    %194 = arith.mulf %184, %193 : vector<2x128xf32>
    %195 = vector.broadcast %177 : vector<1x128xf32> to vector<2x128xf32>
    %196 = arith.mulf %194, %195 : vector<2x128xf32>
    %197 = vector.broadcast %178 : vector<1x128xf32> to vector<2x128xf32>
    %198 = arith.addf %196, %197 : vector<2x128xf32>
    %c0_106 = arith.constant 0 : index
    %c0_107 = arith.constant 0 : index
    %199 = vector.load %arg17[%c0_106, %c0_107] : memref<2x128xf32, #tpu.memory_space<vmem>>, vector<2x128xf32>
    tpu.vector_store %arg17[%c0_106, %c0_107], %198 {strides = array<i32>} : memref<2x128xf32, #tpu.memory_space<vmem>>, vector<2x128xf32>,
    return
  }
}

</mosaic_0001>

<bundles_post_ra>
// kernel: _lambda_.1
= control target key start
LH: loop header
LB: loop body
LE: loop exit
PB: predicated region body
PF: predicated region fallthrough
CT: control target
= control target key end

     0   :  { %s2379_s0 = inlined_call_operand.vmem [shape: f32[16,128], index: 0, kind: input, shape index: {}]   ;;  %s2380_s1 = inlined_call_operand.hbm [shape: f32[1,128], index: 1, kind: input, shape index: {}]   ;;  %s2381_s2 = inlined_call_operand.hbm [shape: f32[1,128], index: 2, kind: input, shape index: {}]   ;;  %s2382_s3 = inlined_call_operand.hbm [shape: bf16[128,128], index: 3, kind: input, shape index: {}]   ;;  %s2383_s4 = inlined_call_operand.hbm [shape: f32[1,128], index: 4, kind: input, shape index: {}]   ;;  %s2384_s5 = inlined_call_operand.vmem [shape: bf16[16,16], index: 5, kind: input, shape index: {}]   ;;  %s2385_s6 = inlined_call_operand.hbm [shape: f32[2,1,128], index: 6, kind: input, shape index: {}]   ;;  %s2386_s7 = inlined_call_operand.hbm [shape: f32[2,1,128], index: 7, kind: input, shape index: {}]   ;;  %s2387_s8 = inlined_call_operand.hbm [shape: bf16[2,128,128], index: 8, kind: input, shape index: {}]   ;;  %s2388_s9 = inlined_call_operand.hbm [shape: f32[2,1,128], index: 9, kind: input, shape index: {}]   ;;  %s2389_s10 = inlined_call_operand.hbm [shape: bf16[2,16], index: 10, kind: input, shape index: {}]   ;;  %s2390_s11 = inlined_call_operand.hbm [shape: f32[2,1,128], index: 11, kind: input, shape index: {}]   ;;  %s2391_s12 = inlined_call_operand.hbm [shape: f32[2,1,128], index: 12, kind: input, shape index: {}]   ;;  %s2392_s13 = inlined_call_operand.vmem [shape: bf16[2,128,128], index: 13, kind: input, shape index: {}]   ;;  %s2393_s14 = inlined_call_operand.hbm [shape: f32[2,1,128], index: 14, kind: input, shape index: {}]   ;;  %s2394_s15 = inlined_call_operand.hbm [shape: f32[1,128], index: 15, kind: input, shape index: {}]   ;;  %s2395_s16 = inlined_call_operand.hbm [shape: f32[1,128], index: 16, kind: input, shape index: {}]   ;;  %s2396_s17 = inlined_call_operand.hbm [shape: f32[2,128], index: 17, kind: output, shape index: {}]  }
   0x1   :  { %2399 = sst [smem:[#allocation35_spill]] %s2379_s0 }
   0x2   :  { %2400 = sst [smem:[#allocation36_spill]] %s2380_s1 }
   0x3   :  { %22 = vsyncpa [#allocation3], 0 }
   0x4   :  { %23 = vsyncpa [#allocation6], 0 }
   0x5   :  { %24 = vsyncpa [#allocation9], 0 }
   0x6   :  { %25 = vsyncpa [#allocation12], 0 }
   0x7   :  { %26 = vsyncpa [#allocation15], 0 }
   0x8   :  { %27 = vsyncpa [#allocation18], 0 }
   0x9   :  { %28 = vsyncpa [#allocation21], 0 }
   0xa   :  { %29 = vsyncpa [#allocation24], 0 }
   0xb   :  { %30 = vsyncpa [#allocation4], 0  ;;  %s1890_s24 = smov [#allocation5]   ;;  %s1891_s26 = smov [#allocation8]  }
   0xc   :  { %s49_s25 = sshll.u32 %s1890_s24, 4  ;;  %s71_s27 = sshll.u32 %s1891_s26, 4  ;;  %s50_s25 = int_to_ptr.vmem [resolvable:$true] %s49_s25  ;;  %s72_s27 = int_to_ptr.vmem [resolvable:$true] %s71_s27 }
   0xd   :  { %s1542_s0 = scalar_lea.hbm %s2381_s2, 16 }
   0xe   :  { %p1543_p0 = scmp.ne.s32.totalorder %s2381_s2, %s1542_s0  ;;  %p1546_p1 = scmp.lt.u32.totalorder %s1542_s0, %s2381_s2 }
  0x10   :  { %p1548_p2 = pnand %p1546_p1, %p1543_p0 }
  0x12   :  { %1551 = shalt.err (!%p1548_p2)
}
  0x13   :  { %s1552_s20 = scalar_lea.vmem %s50_s25, 16  ;;  %s1556_s21 = scalar_lea.vmem %s50_s25, 32 }
  0x14   :  { %p1553_p3 = scmp.ne.s32.totalorder %s50_s25, %s1552_s20  ;;  %p1557_p4 = scmp.lt.s32.totalorder %s50_s25, %s50_s25 }
  0x15   :  { %p1558_p5 = scmp.lt.s32.totalorder %s1556_s21, %s1552_s20 }
  0x17   :  { %p1559_p6 = por %p1558_p5, %p1557_p4 }
  0x19   :  { %p1560_p7 = pnand %p1559_p6, %p1553_p3 }
  0x1b   :  { %1563 = shalt.err (!%p1560_p7)
}
  0x1c   :  { %52 = dma.hbm_to_vmem [thread:$0]  %s2381_s2, 16, %s50_s25, [#allocation6]  }
  0x1d   :  { %s1564_s28 = scalar_lea.hbm %s2383_s4, 16 }
  0x1e   :  { %p1565_p8 = scmp.ne.s32.totalorder %s2383_s4, %s1564_s28  ;;  %p1568_p9 = scmp.lt.u32.totalorder %s1564_s28, %s2383_s4 }
  0x20   :  { %p1570_p10 = pnand %p1568_p9, %p1565_p8 }
  0x22   :  { %1573 = shalt.err (!%p1570_p10)
}
  0x23   :  { %s1574_s19 = scalar_lea.vmem %s72_s27, 16  ;;  %s1578_s1 = scalar_lea.vmem %s72_s27, 32 }
  0x24   :  { %p1575_p11 = scmp.ne.s32.totalorder %s72_s27, %s1574_s19  ;;  %p1579_p12 = scmp.lt.s32.totalorder %s72_s27, %s72_s27 }
  0x25   :  { %p1580_p13 = scmp.lt.s32.totalorder %s1578_s1, %s1574_s19 }
  0x27   :  { %p1581_p0 = por %p1580_p13, %p1579_p12 }
  0x29   :  { %p1582_p1 = pnand %p1581_p0, %p1575_p11 }
  0x2b   :  { %1585 = shalt.err (!%p1582_p1)
}
  0x2c   :  { %74 = dma.hbm_to_vmem [thread:$0]  %s2383_s4, 16, %s72_s27, [#allocation9]  }
  0x2d   :  { %s1892_s20 = smov [#allocation11]   ;;  %s1893_s22 = smov [#allocation14]  }
  0x2e   :  { %s94_s21 = sshll.u32 %s1892_s20, 4  ;;  %s118_s23 = sshll.u32 %s1893_s22, 4  ;;  %s95_s21 = int_to_ptr.vmem [resolvable:$true] %s94_s21  ;;  %s2025_s23 = int_to_ptr.vmem [resolvable:$true] %s118_s23 }
  0x2f   :  { %s1586_s28 = scalar_lea.hbm %s2386_s7, 32 }
  0x30   :  { %p1587_p2 = scmp.ne.s32.totalorder %s2386_s7, %s1586_s28  ;;  %p1590_p3 = scmp.lt.u32.totalorder %s1586_s28, %s2386_s7 }
  0x32   :  { %p1592_p4 = pnand %p1590_p3, %p1587_p2 }
  0x34   :  { %1595 = shalt.err (!%p1592_p4)
}
  0x35   :  { %s1596_s4 = scalar_lea.vmem %s95_s21, 32  ;;  %p1601_p6 = scmp.lt.s32.totalorder %s95_s21, %s95_s21 }
  0x36   :  { %p1597_p5 = scmp.ne.s32.totalorder %s95_s21, %s1596_s4  ;;  %p1602_p7 = scmp.lt.s32.totalorder %s1596_s4, %s1596_s4 }
  0x38   :  { %p1603_p8 = por %p1602_p7, %p1601_p6 }
  0x3a   :  { %p1604_p9 = pnand %p1603_p8, %p1597_p5 }
  0x3c   :  { %1607 = shalt.err (!%p1604_p9)
}
  0x3d   :  { %s1894_s27 = smov 16   ;;  %s1895_s19 = smov 1  }
  0x3e   :  { %100 = dma.hbm_to_vmem [thread:$0]  %s2386_s7, 32, %s95_s21, [#allocation12], %s1894_s27, %s1894_s27, %s1895_s19  }
  0x3f   :  { %s1608_s22 = scalar_lea.hbm %s2388_s9, 32 }
  0x40   :  { %p1609_p10 = scmp.ne.s32.totalorder %s2388_s9, %s1608_s22  ;;  %p1612_p11 = scmp.lt.u32.totalorder %s1608_s22, %s2388_s9 }
  0x42   :  { %p1614_p12 = pnand %p1612_p11, %p1609_p10 }
  0x44   :  { %1617 = shalt.err (!%p1614_p12)
}
  0x45   :  { %s1618_s0 = scalar_lea.vmem %s2025_s23, 32  ;;  %p1623_p0 = scmp.lt.s32.totalorder %s2025_s23, %s2025_s23 }
  0x46   :  { %p1619_p13 = scmp.ne.s32.totalorder %s2025_s23, %s1618_s0  ;;  %p1624_p1 = scmp.lt.s32.totalorder %s1618_s0, %s1618_s0 }
  0x48   :  { %p1625_p2 = por %p1624_p1, %p1623_p0 }
  0x4a   :  { %p1626_p3 = pnand %p1625_p2, %p1619_p13 }
  0x4c   :  { %1629 = shalt.err (!%p1626_p3)
}
  0x4d   :  { %124 = dma.hbm_to_vmem [thread:$0]  %s2388_s9, 32, %s2025_s23, [#allocation15], %s1894_s27, %s1894_s27, %s1895_s19  }
  0x4e   :  { %s1896_s30 = smov [#allocation17]   ;;  %s1897_s4 = smov [#allocation20]  }
  0x4f   :  { %s140_s18 = sshll.u32 %s1896_s30, 4  ;;  %s166_s1 = sshll.u32 %s1897_s4, 4  ;;  %s141_s18 = int_to_ptr.vmem [resolvable:$true] %s140_s18  ;;  %s2062_s1 = int_to_ptr.vmem [resolvable:$true] %s166_s1 }
  0x50   :  { %s1630_s20 = scalar_lea.hbm %s2390_s11, 32 }
  0x51   :  { %p1631_p4 = scmp.ne.s32.totalorder %s2390_s11, %s1630_s20  ;;  %p1634_p5 = scmp.lt.u32.totalorder %s1630_s20, %s2390_s11 }
  0x53   :  { %p1636_p6 = pnand %p1634_p5, %p1631_p4 }
  0x55   :  { %1639 = shalt.err (!%p1636_p6)
}
  0x56   :  { %s1640_s9 = scalar_lea.vmem %s141_s18, 32  ;;  %p1645_p8 = scmp.lt.s32.totalorder %s141_s18, %s141_s18 }
  0x57   :  { %p1641_p7 = scmp.ne.s32.totalorder %s141_s18, %s1640_s9  ;;  %p1646_p9 = scmp.lt.s32.totalorder %s1640_s9, %s1640_s9 }
  0x59   :  { %p1647_p10 = por %p1646_p9, %p1645_p8 }
  0x5b   :  { %p1648_p11 = pnand %p1647_p10, %p1641_p7 }
  0x5d   :  { %1651 = shalt.err (!%p1648_p11)
}
  0x5e   :  { %146 = dma.hbm_to_vmem [thread:$0]  %s2390_s11, 32, %s141_s18, [#allocation18], %s1894_s27, %s1894_s27, %s1895_s19  }
  0x5f   :  { %s1652_s21 = scalar_lea.hbm %s2393_s14, 32 }
  0x60   :  { %p1653_p12 = scmp.ne.s32.totalorder %s2393_s14, %s1652_s21  ;;  %p1656_p13 = scmp.lt.u32.totalorder %s1652_s21, %s2393_s14 }
  0x62   :  { %p1658_p0 = pnand %p1656_p13, %p1653_p12 }
  0x64   :  { %1661 = shalt.err (!%p1658_p0)
}
  0x65   :  { %s1662_s20 = scalar_lea.vmem %s2062_s1, 32  ;;  %p1667_p2 = scmp.lt.s32.totalorder %s2062_s1, %s2062_s1 }
  0x66   :  { %p1663_p1 = scmp.ne.s32.totalorder %s2062_s1, %s1662_s20  ;;  %p1668_p3 = scmp.lt.s32.totalorder %s1662_s20, %s1662_s20 }
  0x68   :  { %p1669_p4 = por %p1668_p3, %p1667_p2 }
  0x6a   :  { %p1670_p5 = pnand %p1669_p4, %p1663_p1 }
  0x6c   :  { %1673 = shalt.err (!%p1670_p5)
}
  0x6d   :  { %172 = dma.hbm_to_vmem [thread:$0]  %s2393_s14, 32, %s2062_s1, [#allocation21], %s1894_s27, %s1894_s27, %s1895_s19  }
  0x6e   :  { %s1898_s22 = smov [#allocation2]   ;;  %s1899_s26 = smov [#allocation7]  }
  0x6f   :  { %s39_s24 = sshll.u32 %s1898_s22, 4  ;;  %s58_s28 = sshll.u32 %s1899_s26, 4  ;;  %s40_s24 = int_to_ptr.vmem [resolvable:$true] %s39_s24  ;;  %s2099_s28 = int_to_ptr.vmem [resolvable:$true] %s58_s28 }
  0x70   :  { %s2401_s29 = sld [smem:[#allocation36_spill]] }
  0x76   :  { %s1674_s0 = scalar_lea.hbm %s2401_s29, 16 }
  0x77   :  { %p1675_p6 = scmp.ne.s32.totalorder %s2401_s29, %s1674_s0  ;;  %p1678_p7 = scmp.lt.u32.totalorder %s1674_s0, %s2401_s29 }
  0x79   :  { %p1680_p8 = pnand %p1678_p7, %p1675_p6 }
  0x7b   :  { %1683 = shalt.err (!%p1680_p8)
}
  0x7c   :  { %s1684_s14 = scalar_lea.vmem %s40_s24, 16  ;;  %s1688_s1 = scalar_lea.vmem %s40_s24, 32 }
  0x7d   :  { %p1685_p9 = scmp.ne.s32.totalorder %s40_s24, %s1684_s14  ;;  %p1689_p10 = scmp.lt.s32.totalorder %s40_s24, %s40_s24 }
  0x7e   :  { %p1690_p11 = scmp.lt.s32.totalorder %s1688_s1, %s1684_s14 }
  0x80   :  { %p1691_p12 = por %p1690_p11, %p1689_p10 }
  0x82   :  { %p1692_p13 = pnand %p1691_p12, %p1685_p9 }
  0x84   :  { %1695 = shalt.err (!%p1692_p13)
}
  0x85   :  { %42 = dma.hbm_to_vmem [thread:$0]  %s2401_s29, 16, %s40_s24, [#allocation3]  }
  0x86   :  { %s1696_s18 = scalar_lea.hbm %s2382_s3, 1024 }
  0x87   :  { %p1697_p0 = scmp.ne.s32.totalorder %s2382_s3, %s1696_s18  ;;  %p1700_p1 = scmp.lt.u32.totalorder %s1696_s18, %s2382_s3 }
  0x89   :  { %p1702_p2 = pnand %p1700_p1, %p1697_p0 }
  0x8b   :  { %1705 = shalt.err (!%p1702_p2)
}
  0x8c   :  { %s1706_s0 = scalar_lea.vmem %s2099_s28, 1024  ;;  %p1711_p4 = scmp.lt.s32.totalorder %s2099_s28, %s2099_s28 }
  0x8d   :  { %p1707_p3 = scmp.ne.s32.totalorder %s2099_s28, %s1706_s0  ;;  %p1712_p5 = scmp.lt.s32.totalorder %s1706_s0, %s1706_s0 }
  0x8f   :  { %p1713_p6 = por %p1712_p5, %p1711_p4 }
  0x91   :  { %p1714_p7 = pnand %p1713_p6, %p1707_p3 }
  0x93   :  { %1717 = shalt.err (!%p1714_p7)
}
  0x94   :  { %s1900_s24 = smov 64   ;;  %s1901_s29 = smov 4  }
  0x95   :  { %64 = dma.hbm_to_vmem [thread:$0]  %s2382_s3, 1024, %s2099_s28, [#allocation6], %s1900_s24, %s1900_s24, %s1901_s29  }
  0x96   :  { %s1902_s30 = smov [#allocation10]   ;;  %s1903_s14 = smov [#allocation13]  }
  0x97   :  { %s82_s4 = sshll.u32 %s1902_s30, 4  ;;  %s106_s1 = sshll.u32 %s1903_s14, 4  ;;  %s83_s4 = int_to_ptr.vmem [resolvable:$true] %s82_s4  ;;  %s2133_s1 = int_to_ptr.vmem [resolvable:$true] %s106_s1 }
  0x98   :  { %s1718_s20 = scalar_lea.hbm %s2385_s6, 32 }
  0x99   :  { %p1719_p8 = scmp.ne.s32.totalorder %s2385_s6, %s1718_s20  ;;  %p1722_p9 = scmp.lt.u32.totalorder %s1718_s20, %s2385_s6 }
  0x9b   :  { %p1724_p10 = pnand %p1722_p9, %p1719_p8 }
  0x9d   :  { %1727 = shalt.err (!%p1724_p10)
}
  0x9e   :  { %s1728_s3 = scalar_lea.vmem %s83_s4, 32  ;;  %p1733_p12 = scmp.lt.s32.totalorder %s83_s4, %s83_s4 }
  0x9f   :  { %p1729_p11 = scmp.ne.s32.totalorder %s83_s4, %s1728_s3  ;;  %p1734_p13 = scmp.lt.s32.totalorder %s1728_s3, %s1728_s3 }
  0xa1   :  { %p1735_p0 = por %p1734_p13, %p1733_p12 }
  0xa3   :  { %p1736_p1 = pnand %p1735_p0, %p1729_p11 }
  0xa5   :  { %1739 = shalt.err (!%p1736_p1)
}
  0xa6   :  { %88 = dma.hbm_to_vmem [thread:$0]  %s2385_s6, 32, %s83_s4, [#allocation9], %s1894_s27, %s1894_s27, %s1895_s19  }
  0xa7   :  { %s1740_s7 = scalar_lea.hbm %s2387_s8, 2048 }
  0xa8   :  { %p1741_p2 = scmp.ne.s32.totalorder %s2387_s8, %s1740_s7  ;;  %p1744_p3 = scmp.lt.u32.totalorder %s1740_s7, %s2387_s8 }
  0xaa   :  { %p1746_p4 = pnand %p1744_p3, %p1741_p2 }
  0xac   :  { %1749 = shalt.err (!%p1746_p4)
}
  0xad   :  { %s1750_s25 = scalar_lea.vmem %s2133_s1, 2048  ;;  %p1755_p6 = scmp.lt.s32.totalorder %s2133_s1, %s2133_s1 }
  0xae   :  { %p1751_p5 = scmp.ne.s32.totalorder %s2133_s1, %s1750_s25  ;;  %p1756_p7 = scmp.lt.s32.totalorder %s1750_s25, %s1750_s25 }
  0xb0   :  { %p1757_p8 = por %p1756_p7, %p1755_p6 }
  0xb2   :  { %p1758_p9 = pnand %p1757_p8, %p1751_p5 }
  0xb4   :  { %1761 = shalt.err (!%p1758_p9)
}
  0xb5   :  { %112 = dma.hbm_to_vmem [thread:$0]  %s2387_s8, 2048, %s2133_s1, [#allocation12], %s1900_s24, %s1900_s24, %s1901_s29  }
  0xb6   :  { %s1904_s20 = smov [#allocation16]   ;;  %s1905_s18 = smov [#allocation19]  }
  0xb7   :  { %s131_s11 = sshll.u32 %s1904_s20, 4  ;;  %s152_s22 = sshll.u32 %s1905_s18, 4  ;;  %s132_s11 = int_to_ptr.vmem [resolvable:$true] %s131_s11  ;;  %s2170_s22 = int_to_ptr.vmem [resolvable:$true] %s152_s22 }
  0xb8   :  { %s1762_s28 = scalar_lea.hbm %s2389_s10, 16 }
  0xb9   :  { %p1763_p10 = scmp.ne.s32.totalorder %s2389_s10, %s1762_s28  ;;  %p1766_p11 = scmp.lt.u32.totalorder %s1762_s28, %s2389_s10 }
  0xbb   :  { %p1768_p12 = pnand %p1766_p11, %p1763_p10 }
  0xbd   :  { %1771 = shalt.err (!%p1768_p12)
}
  0xbe   :  { %s1772_s8 = scalar_lea.vmem %s132_s11, 16  ;;  %s1776_s24 = scalar_lea.vmem %s132_s11, 32 }
  0xbf   :  { %p1773_p13 = scmp.ne.s32.totalorder %s132_s11, %s1772_s8  ;;  %p1777_p0 = scmp.lt.s32.totalorder %s132_s11, %s132_s11 }
  0xc0   :  { %p1778_p1 = scmp.lt.s32.totalorder %s1776_s24, %s1772_s8 }
  0xc2   :  { %p1779_p2 = por %p1778_p1, %p1777_p0 }
  0xc4   :  { %p1780_p3 = pnand %p1779_p2, %p1773_p13 }
  0xc6   :  { %1783 = shalt.err (!%p1780_p3)
}
  0xc7   :  { %134 = dma.hbm_to_vmem [thread:$0]  %s2389_s10, 16, %s132_s11, [#allocation15]  }
  0xc8   :  { %s1784_s14 = scalar_lea.hbm %s2391_s12, 32 }
  0xc9   :  { %p1785_p4 = scmp.ne.s32.totalorder %s2391_s12, %s1784_s14  ;;  %p1788_p5 = scmp.lt.u32.totalorder %s1784_s14, %s2391_s12 }
  0xcb   :  { %p1790_p6 = pnand %p1788_p5, %p1785_p4 }
  0xcd   :  { %1793 = shalt.err (!%p1790_p6)
}
  0xce   :  { %s1794_s20 = scalar_lea.vmem %s2170_s22, 32  ;;  %p1799_p8 = scmp.lt.s32.totalorder %s2170_s22, %s2170_s22 }
  0xcf   :  { %p1795_p7 = scmp.ne.s32.totalorder %s2170_s22, %s1794_s20  ;;  %p1800_p9 = scmp.lt.s32.totalorder %s1794_s20, %s1794_s20 }
  0xd1   :  { %p1801_p10 = por %p1800_p9, %p1799_p8 }
  0xd3   :  { %p1802_p11 = pnand %p1801_p10, %p1795_p7 }
  0xd5   :  { %1805 = shalt.err (!%p1802_p11)
}
  0xd6   :  { %158 = dma.hbm_to_vmem [thread:$0]  %s2391_s12, 32, %s2170_s22, [#allocation18], %s1894_s27, %s1894_s27, %s1895_s19  }
  0xd7   :  { %s1906_s18 = smov [#allocation22]   ;;  %s1907_s3 = smov [#allocation23]  }
  0xd8   :  { %s179_s26 = sshll.u32 %s1906_s18, 4  ;;  %s189_s28 = sshll.u32 %s1907_s3, 4  ;;  %s180_s26 = int_to_ptr.vmem [resolvable:$true] %s179_s26  ;;  %s190_s28 = int_to_ptr.vmem [resolvable:$true] %s189_s28 }
  0xd9   :  { %s1806_s0 = scalar_lea.hbm %s2394_s15, 16 }
  0xda   :  { %p1807_p12 = scmp.ne.s32.totalorder %s2394_s15, %s1806_s0  ;;  %p1810_p13 = scmp.lt.u32.totalorder %s1806_s0, %s2394_s15 }
  0xdc   :  { %p1812_p0 = pnand %p1810_p13, %p1807_p12 }
  0xde   :  { %1815 = shalt.err (!%p1812_p0)
}
  0xdf   :  { %s1816_s12 = scalar_lea.vmem %s180_s26, 16  ;;  %s1820_s27 = scalar_lea.vmem %s180_s26, 32 }
  0xe0   :  { %p1817_p1 = scmp.ne.s32.totalorder %s180_s26, %s1816_s12  ;;  %p1821_p2 = scmp.lt.s32.totalorder %s180_s26, %s180_s26 }
  0xe1   :  { %p1822_p3 = scmp.lt.s32.totalorder %s1820_s27, %s1816_s12 }
  0xe3   :  { %p1823_p4 = por %p1822_p3, %p1821_p2 }
  0xe5   :  { %p1824_p5 = pnand %p1823_p4, %p1817_p1 }
  0xe7   :  { %1827 = shalt.err (!%p1824_p5)
}
  0xe8   :  { %182 = dma.hbm_to_vmem [thread:$0]  %s2394_s15, 16, %s180_s26, [#allocation21]  }
  0xe9   :  { %s1828_s30 = scalar_lea.hbm %s2395_s16, 16 }
  0xea   :  { %p1829_p6 = scmp.ne.s32.totalorder %s2395_s16, %s1828_s30  ;;  %p1832_p7 = scmp.lt.u32.totalorder %s1828_s30, %s2395_s16 }
  0xec   :  { %p1834_p8 = pnand %p1832_p7, %p1829_p6 }
  0xee   :  { %1837 = shalt.err (!%p1834_p8)
}
  0xef   :  { %s1838_s4 = scalar_lea.vmem %s190_s28, 16  ;;  %s1842_s20 = scalar_lea.vmem %s190_s28, 32 }
  0xf0   :  { %p1839_p9 = scmp.ne.s32.totalorder %s190_s28, %s1838_s4  ;;  %p1843_p10 = scmp.lt.s32.totalorder %s190_s28, %s190_s28 }
  0xf1   :  { %p1844_p11 = scmp.lt.s32.totalorder %s1842_s20, %s1838_s4 }
  0xf3   :  { %p1845_p12 = por %p1844_p11, %p1843_p10 }
  0xf5   :  { %p1846_p13 = pnand %p1845_p12, %p1839_p9 }
  0xf7   :  { %1849 = shalt.err (!%p1846_p13)
}
  0xf8   :  { %192 = dma.hbm_to_vmem [thread:$0]  %s2395_s16, 16, %s190_s28, [#allocation24]  }
  0xf9   :  { %1872 = dma.done.wait [#allocation3], 16  }
  0xfa   :  { %1873 = vsyncadd [#allocation3], 4294967280 }
  0xfb   :  { %1874 = dma.done.wait [#allocation6], 1040  }
  0xfc   :  { %1875 = vsyncadd [#allocation6], 4294966256 }
  0xfd   :  { %1876 = dma.done.wait [#allocation9], 48  }
  0xfe   :  { %1877 = vsyncadd [#allocation9], 4294967248 }
  0xff   :  { %1878 = dma.done.wait [#allocation12], 2080  }
 0x100   :  { %1879 = vsyncadd [#allocation12], 4294965216 }
 0x101   :  { %1880 = dma.done.wait [#allocation15], 48  }
 0x102   :  { %1881 = vsyncadd [#allocation15], 4294967248 }
 0x103   :  { %1882 = dma.done.wait [#allocation18], 64  }
 0x104   :  { %1883 = vsyncadd [#allocation18], 4294967232 }
 0x105   :  { %1884 = dma.done.wait [#allocation21], 48  }
 0x106   :  { %1885 = vsyncadd [#allocation21], 4294967248 }
 0x107   :  { %1886 = dma.done.wait [#allocation24], 16  }
 0x108   :  { %1887 = vsyncadd [#allocation24], 4294967280  ;;  %v1908_v0 = vmov 0.0   ;;  %vm1909_vm0 = vmmov 0   ;;  %v1489_v1 = vld [vmem:[#allocation7] sm:$0xff]   ;;  %v1490_v2 = vld [vmem:[#allocation7 + $0x8] sm:$0xff]  }
 0x109   :  { %1350 = vmatprep.subr.bf16.mxu0 %v1908_v0  ;;  %1366 = vmatprep.mubr.msk.bf16.mxu0 %vm1909_vm0, %v1908_v0  ;;  %v1491_v3 = vld [vmem:[#allocation7 + $0x10] sm:$0xff]   ;;  %s2402_s18 = sld [smem:[#allocation35_spill]]  ;;  %v1492_v6 = vld [vmem:[#allocation7 + $0x18] sm:$0xff]   ;;  %v1493_v9 = vld [vmem:[#allocation7 + $0x20] sm:$0xff]   ;;  %vm558_vm1 = vcmask 130048   ;;  %vm859_vm2 = vcmask 1041408  }
 0x10a   :  { %1370 = vmatprep.subr.bf16.mxu1 %v1908_v0  ;;  %1386 = vmatprep.mubr.msk.bf16.mxu1 %vm1909_vm0, %v1908_v0  ;;  %v1494_v12 = vld [vmem:[#allocation7 + $0x28] sm:$0xff]   ;;  %v1495_v15 = vld [vmem:[#allocation7 + $0x30] sm:$0xff]   ;;  %v1496_v18 = vld [vmem:[#allocation7 + $0x38] sm:$0xff]  }
 0x10b   :  { %1351 = vmatpush3.bf16.msra.mxu0 %v1489_v1  ;;  %v1222_v33 = vld [vmem:[#allocation2] ss:$0 sm:$0xff]  ;;  %v1223_v36 = vld [vmem:[#allocation5] ss:$0 sm:$0xff]  ;;  %v1497_v42 = vld [vmem:[#allocation13] sm:$0xff]  }
 0x10c   :  { %1352 = vmatprep.subr.bf16.mxu0 %v1908_v0  ;;  %1371 = vmatpush3.bf16.msra.mxu1 %v1497_v42  ;;  %v1498_v43 = vld [vmem:[#allocation13 + $0x8] sm:$0xff]   ;;  %v1499_v44 = vld [vmem:[#allocation13 + $0x10] sm:$0xff]   ;;  %v1500_v45 = vld [vmem:[#allocation13 + $0x18] sm:$0xff]  }
 0x10d   :  { %1372 = vmatprep.subr.bf16.mxu1 %v1908_v0  ;;  %v1501_v46 = vld [vmem:[#allocation13 + $0x20] sm:$0xff]   ;;  %v1502_v47 = vld [vmem:[#allocation13 + $0x28] sm:$0xff]   ;;  %v1503_v48 = vld [vmem:[#allocation13 + $0x30] sm:$0xff]  }
 0x10e   :  { %v1504_v49 = vld [vmem:[#allocation13 + $0x38] sm:$0xff]  }
 0x10f   :  { %1353 = vmatpush3.bf16.msra.mxu0 %v1490_v2  ;;  %v236_v4 = vld [vmem:[%s2402_s18] sm:$0xff]  ;;  %v237_v5 = vld [vmem:[%s2402_s18 + $0x8] sm:$0xff] }
 0x110   :  { %1354 = vmatprep.subr.bf16.mxu0 %v1908_v0  ;;  %v240_v7 = vadd.f32 %v237_v5, %v236_v4  ;;  %1373 = vmatpush3.bf16.msra.mxu1 %v1498_v43  ;;  %v1224_v50 = vld [vmem:[#allocation8] ss:$0 sm:$0xff] }
 0x111   :  { %1374 = vmatprep.subr.bf16.mxu1 %v1908_v0 }
 0x112   :  { %v241_v8 = vrot.slane %v240_v7, 4 }
 0x113   :  { %1355 = vmatpush3.bf16.msra.mxu0 %v1491_v3 }
 0x114   :  { %1356 = vmatprep.subr.bf16.mxu0 %v1908_v0  ;;  %v242_v10 = vadd.f32 %v241_v8, %v240_v7  ;;  %1375 = vmatpush3.bf16.msra.mxu1 %v1499_v44 }
 0x115   :  { %1376 = vmatprep.subr.bf16.mxu1 %v1908_v0 }
 0x116   :  { %v243_v11 = vrot.slane %v242_v10, 2 }
 0x117   :  { %1357 = vmatpush3.bf16.msra.mxu0 %v1492_v6 }
 0x118   :  { %1358 = vmatprep.subr.bf16.mxu0 %v1908_v0  ;;  %v244_v13 = vadd.f32 %v243_v11, %v242_v10  ;;  %1377 = vmatpush3.bf16.msra.mxu1 %v1500_v45 }
 0x119   :  { %1378 = vmatprep.subr.bf16.mxu1 %v1908_v0 }
 0x11a   :  { %v245_v14 = vrot.slane %v244_v13, 1 }
 0x11b   :  { %1359 = vmatpush3.bf16.msra.mxu0 %v1493_v9 }
 0x11c   :  { %1360 = vmatprep.subr.bf16.mxu0 %v1908_v0  ;;  %v246_v16 = vadd.f32 %v245_v14, %v244_v13  ;;  %1379 = vmatpush3.bf16.msra.mxu1 %v1501_v46 }
 0x11d   :  { %1380 = vmatprep.subr.bf16.mxu1 %v1908_v0 }
 0x11e   :  { %v247_v17 = vmul.f32 0.0625, %v246_v16 }
 0x11f   :  { %1361 = vmatpush3.bf16.msra.mxu0 %v1494_v12 }
 0x120   :  { %1362 = vmatprep.subr.bf16.mxu0 %v1908_v0  ;;  %v248_v19 = vsub.f32 %v236_v4, %v247_v17  ;;  %v249_v20 = vsub.f32 %v237_v5, %v247_v17  ;;  %1381 = vmatpush3.bf16.msra.mxu1 %v1502_v47 }
 0x121   :  { %1382 = vmatprep.subr.bf16.mxu1 %v1908_v0 }
 0x122   :  { %v250_v21 = vmul.f32 %v248_v19, %v248_v19  ;;  %v251_v22 = vmul.f32 %v249_v20, %v249_v20 }
 0x123   :  { %1363 = vmatpush3.bf16.msra.mxu0 %v1495_v15 }
 0x124   :  { %1364 = vmatprep.subr.bf16.mxu0 %v1908_v0  ;;  %v252_v23 = vadd.f32 %v251_v22, %v250_v21  ;;  %1383 = vmatpush3.bf16.msra.mxu1 %v1503_v48  ;;  %v1234_v21 = vld [vmem:[#allocation11] ss:$0 sm:$0xff] }
 0x125   :  { %1384 = vmatprep.subr.bf16.mxu1 %v1908_v0 }
 0x126   :  { %v253_v24 = vrot.slane %v252_v23, 4 }
 0x127   :  { %1365 = vmatpush3.bf16.msra.mxu0 %v1496_v18  ;;  %v1233_v18 = vld [vmem:[#allocation10] ss:$0 sm:$0xff] }
 0x128   :  { %1390 = vmatprep.subr.bf16.mxu0 %v1908_v0  ;;  %v254_v25 = vadd.f32 %v253_v24, %v252_v23  ;;  %1385 = vmatpush3.bf16.msra.mxu1 %v1504_v49 }
 0x129   :  { %1396 = vmatprep.subr.bf16.mxu1 %v1908_v0 }
 0x12a   :  { %v255_v26 = vrot.slane %v254_v25, 2 }
 0x12c   :  { %v256_v27 = vadd.f32 %v255_v26, %v254_v25 }
 0x12e   :  { %v257_v28 = vrot.slane %v256_v27, 1 }
 0x130   :  { %v258_v29 = vadd.f32 %v257_v28, %v256_v27 }
 0x132   :  { %v259_v30 = vmul.f32 0.0625, %v258_v29 }
 0x134   :  { %v260_v31 = vadd.f32 1e-05, %v259_v30 }
 0x136   :  { %1530 = vrsqrt.f32 %v260_v31 }
 0x140   :  { %v1531_v32 = vpop.eup %1530 }
 0x141   :  { %v262_v34 = vmul.f32 %v1531_v32, %v248_v19  ;;  %v263_v35 = vmul.f32 %v1531_v32, %v249_v20  ;;  %v2271_v32 = vld [vmem:[%s2384_s5] sm:$0xff]  }
 0x143   :  { %v270_v37 = vmul.f32 %v1222_v33, %v262_v34  ;;  %v271_v38 = vmul.f32 %v1222_v33, %v263_v35  ;;  %v1506_v33 = vld [vmem:[#allocation13 + $0x40] sm:$0xff]   ;;  %v1507_v34 = vld [vmem:[#allocation13 + $0x48] sm:$0xff]   ;;  %v1508_v35 = vld [vmem:[#allocation13 + $0x50] sm:$0xff]  }
 0x145   :  { %v278_v39 = vadd.f32 %v1223_v36, %v270_v37  ;;  %v279_v40 = vadd.f32 %v1223_v36, %v271_v38  ;;  %v1509_v36 = vld [vmem:[#allocation13 + $0x58] sm:$0xff]   ;;  %v1510_v37 = vld [vmem:[#allocation13 + $0x60] sm:$0xff]   ;;  %v1511_v38 = vld [vmem:[#allocation13 + $0x68] sm:$0xff]  }
 0x147   :  { %v280_v41 = vpack.c.bf16 %v279_v40, %v278_v39  ;;  %v1512_v39 = vld [vmem:[#allocation13 + $0x70] sm:$0xff]   ;;  %v1513_v40 = vld [vmem:[#allocation13 + $0x78] sm:$0xff]  }
 0x149   :  { %1367 = vmatmul.mubr.bf16.vlgmr.msra.gmra.mrb[0].mxu0 %v280_v41  ;;  %v1243_v41 = vld [vmem:[#allocation14] ss:$0 sm:$0xff] }
 0x14a   :  { %1392 = vmatprep.mubr.msk.bf16.mxu0 %vm1909_vm0, %v1908_v0 }
 0x21c   :  { %v386_v51 = vpop.f32.mrb[0].mxu0 }
 0x21d   :  { %v387_v52 = vadd.f32 %v1224_v50, %v386_v51  ;;  %v1368_v53 = vpop.f32.mrb[1].mxu0 }
 0x21e   :  { %v389_v54 = vpop.f32.mrb[2].mxu0 }
 0x21f   :  { %v390_v55 = vadd.f32 %v1224_v50, %v389_v54  ;;  %v1369_v56 = vpop.f32.mrb[3].mxu0  ;;  %v2258_v57 = vmax.f32 %v387_v52, 0.0 }
 0x221   :  { %v2260_v58 = vmax.f32 %v390_v55, 0.0 }
 0x223   :  { %v399_v59 = vadd.f32 %v2260_v58, %v2258_v57 }
 0x225   :  { %v400_v60 = vrot.slane %v399_v59, 4 }
 0x227   :  { %v401_v61 = vadd.f32 %v400_v60, %v399_v59 }
 0x229   :  { %v402_v62 = vrot.slane %v401_v61, 2 }
 0x22b   :  { %v403_v63 = vadd.f32 %v402_v62, %v401_v61 }
 0x22d   :  { %v404_v1 = vrot.slane %v403_v63, 1 }
 0x22f   :  { %v405_v2 = vadd.f32 %v404_v1, %v403_v63 }
 0x231   :  { %v406_v3 = vmul.f32 0.0625, %v405_v2 }
 0x233   :  { %v407_v4 = vsub.f32 %v2258_v57, %v406_v3  ;;  %v408_v5 = vsub.f32 %v2260_v58, %v406_v3 }
 0x235   :  { %v409_v6 = vmul.f32 %v407_v4, %v407_v4  ;;  %v410_v7 = vmul.f32 %v408_v5, %v408_v5 }
 0x237   :  { %v411_v8 = vadd.f32 %v410_v7, %v409_v6 }
 0x239   :  { %v412_v9 = vrot.slane %v411_v8, 4 }
 0x23b   :  { %v413_v10 = vadd.f32 %v412_v9, %v411_v8 }
 0x23d   :  { %v414_v11 = vrot.slane %v413_v10, 2 }
 0x23f   :  { %v415_v12 = vadd.f32 %v414_v11, %v413_v10  ;;  %v1246_v11 = vld [vmem:[#allocation10 + $0x1] ss:$0 sm:$0xff] }
 0x241   :  { %v416_v13 = vrot.slane %v415_v12, 1 }
 0x243   :  { %v417_v14 = vadd.f32 %v416_v13, %v415_v12 }
 0x245   :  { %v418_v15 = vmul.f32 0.0625, %v417_v14  ;;  %v1247_v14 = vld [vmem:[#allocation11 + $0x1] ss:$0 sm:$0xff] }
 0x247   :  { %v419_v16 = vadd.f32 1e-05, %v418_v15 }
 0x249   :  { %1532 = vrsqrt.f32 %v419_v16 }
 0x253   :  { %v1533_v17 = vpop.eup %1532 }
 0x254   :  { %v422_v19 = vmul.f32 %v1533_v17, %v408_v5  ;;  %v421_v20 = vmul.f32 %v1533_v17, %v407_v4 }
 0x256   :  { %v429_v22 = vmul.f32 %v1233_v18, %v421_v20  ;;  %v430_v23 = vmul.f32 %v1233_v18, %v422_v19 }
 0x258   :  { %v437_v24 = vadd.f32 %v1234_v21, %v429_v22  ;;  %v438_v25 = vadd.f32 %v1234_v21, %v430_v23 }
 0x25a   :  { %v439_v26 = vpack.c.bf16 %v438_v25, %v437_v24  ;;  %v1256_v25 = vld [vmem:[#allocation14 + $0x1] ss:$0 sm:$0xff] }
 0x25c   :  { %1387 = vmatmul.mubr.bf16.vlgmr.msra.gmra.mrb[0].mxu1 %v439_v26 }
 0x25d   :  { %1412 = vmatprep.mubr.msk.bf16.mxu1 %vm1909_vm0, %v1908_v0  ;;  %1397 = vmatpush3.bf16.msra.mxu1 %v1506_v33 }
 0x25e   :  { %1398 = vmatprep.subr.bf16.mxu1 %v1908_v0 }
 0x261   :  { %1399 = vmatpush3.bf16.msra.mxu1 %v1507_v34 }
 0x262   :  { %1400 = vmatprep.subr.bf16.mxu1 %v1908_v0 }
 0x265   :  { %1401 = vmatpush3.bf16.msra.mxu1 %v1508_v35 }
 0x266   :  { %1402 = vmatprep.subr.bf16.mxu1 %v1908_v0 }
 0x269   :  { %1403 = vmatpush3.bf16.msra.mxu1 %v1509_v36 }
 0x26a   :  { %1404 = vmatprep.subr.bf16.mxu1 %v1908_v0 }
 0x26d   :  { %1405 = vmatpush3.bf16.msra.mxu1 %v1510_v37 }
 0x26e   :  { %1406 = vmatprep.subr.bf16.mxu1 %v1908_v0 }
 0x271   :  { %1407 = vmatpush3.bf16.msra.mxu1 %v1511_v38  ;;  %v812_v38 = vld [vmem:[#allocation16] sm:$0x1] }
 0x272   :  { %1408 = vmatprep.subr.bf16.mxu1 %v1908_v0 }
 0x275   :  { %1409 = vmatpush3.bf16.msra.mxu1 %v1512_v39  ;;  %v1515_v39 = vld [vmem:[%s2392_s13 + $0x8] sm:$0xff]  }
 0x276   :  { %1410 = vmatprep.subr.bf16.mxu1 %v1908_v0 }
 0x279   :  { %1411 = vmatpush3.bf16.msra.mxu1 %v1513_v40  ;;  %v1516_v40 = vld [vmem:[%s2392_s13 + $0x10] sm:$0xff]  }
 0x27a   :  { %1448 = vmatprep.subr.bf16.mxu1 %v1908_v0 }
 0x32f   :  { %v538_v27 = vpop.f32.mrb[0].mxu1 }
 0x330   :  { %v1388_v28 = vpop.f32.mrb[1].mxu1 }
 0x331   :  { %v541_v29 = vpop.f32.mrb[2].mxu1 }
 0x332   :  { %v545_v30 = vpack.c.bf16 %v541_v29, %v538_v27  ;;  %v1389_v31 = vpop.f32.mrb[3].mxu1 }
 0x334   :  { %1391 = vmatpush3.bf16.msra.mxu0 %v545_v30 }
 0x335   :  { %1416 = vmatprep.subr.bf16.mxu0 %v1908_v0 }
 0x337   :  { %1393 = vmatmul.mubr.msk.bf16.vlgmr.msra.gmra.mrb[4].mxu0 %vm558_vm1, %v2271_v32 }
 0x338   :  { %1418 = vmatprep.mubr.msk.bf16.mxu0 %vm1909_vm0, %v1908_v0 }
 0x40a   :  { %v596_v42 = vpop.f32.mrb[4].mxu0 }
 0x40b   :  { %v597_v43 = vadd.f32 %v1243_v41, %v596_v42  ;;  %v1394_v44 = vpop.f32.mrb[5].mxu0  ;;  %v1518_v42 = vld [vmem:[%s2392_s13 + $0x20] sm:$0xff]  }
 0x40c   :  { %v599_v45 = vpop.f32.mrb[6].mxu0  ;;  %v1520_v44 = vld [vmem:[%s2392_s13 + $0x30] sm:$0xff]  }
 0x40d   :  { %v603_v46 = vmax.f32 %v597_v43, 0.0  ;;  %v600_v47 = vadd.f32 %v1243_v41, %v599_v45  ;;  %v1395_v48 = vpop.f32.mrb[7].mxu0  ;;  %v1517_v41 = vld [vmem:[%s2392_s13 + $0x18] sm:$0xff]   ;;  %v1519_v43 = vld [vmem:[%s2392_s13 + $0x28] sm:$0xff]  }
 0x40e   :  { %v1521_v45 = vld [vmem:[%s2392_s13 + $0x38] sm:$0xff]  }
 0x40f   :  { %v604_v49 = vmax.f32 %v600_v47, 0.0  ;;  %v605_v50 = vadd.f32 %v603_v46, %v2258_v57 }
 0x411   :  { %v606_v51 = vadd.f32 %v604_v49, %v2260_v58 }
 0x413   :  { %v611_v52 = vadd.f32 %v606_v51, %v605_v50 }
 0x415   :  { %v612_v53 = vrot.slane %v611_v52, 4 }
 0x417   :  { %v613_v54 = vadd.f32 %v612_v53, %v611_v52 }
 0x419   :  { %v614_v55 = vrot.slane %v613_v54, 2 }
 0x41b   :  { %v615_v56 = vadd.f32 %v614_v55, %v613_v54 }
 0x41d   :  { %v616_v59 = vrot.slane %v615_v56, 1 }
 0x41f   :  { %v617_v60 = vadd.f32 %v616_v59, %v615_v56 }
 0x421   :  { %v618_v61 = vmul.f32 0.0625, %v617_v60 }
 0x423   :  { %v619_v62 = vsub.f32 %v605_v50, %v618_v61  ;;  %v620_v63 = vsub.f32 %v606_v51, %v618_v61 }
 0x425   :  { %v621_v1 = vmul.f32 %v619_v62, %v619_v62  ;;  %v622_v2 = vmul.f32 %v620_v63, %v620_v63 }
 0x427   :  { %v623_v3 = vadd.f32 %v622_v2, %v621_v1 }
 0x429   :  { %v624_v4 = vrot.slane %v623_v3, 4 }
 0x42b   :  { %v625_v5 = vadd.f32 %v624_v4, %v623_v3 }
 0x42d   :  { %v626_v6 = vrot.slane %v625_v5, 2 }
 0x42f   :  { %v627_v7 = vadd.f32 %v626_v6, %v625_v5 }
 0x431   :  { %v628_v57 = vrot.slane %v627_v7, 1 }
 0x433   :  { %v629_v8 = vadd.f32 %v628_v57, %v627_v7 }
 0x435   :  { %v630_v58 = vmul.f32 0.0625, %v629_v8  ;;  %v1259_v8 = vld [vmem:[#allocation17] ss:$0 sm:$0xff] }
 0x437   :  { %v631_v9 = vadd.f32 1e-05, %v630_v58 }
 0x439   :  { %1534 = vrsqrt.f32 %v631_v9  ;;  %v1260_v9 = vld [vmem:[#allocation19] ss:$0 sm:$0xff] }
 0x443   :  { %v1535_v10 = vpop.eup %1534 }
 0x444   :  { %v634_v12 = vmul.f32 %v1535_v10, %v620_v63  ;;  %v633_v13 = vmul.f32 %v1535_v10, %v619_v62 }
 0x446   :  { %v641_v15 = vmul.f32 %v1246_v11, %v633_v13  ;;  %v642_v16 = vmul.f32 %v1246_v11, %v634_v12  ;;  %v1522_v13 = vld [vmem:[%s2392_s13 + $0x40] sm:$0xff]  }
 0x448   :  { %v649_v17 = vadd.f32 %v1247_v14, %v641_v15  ;;  %v650_v18 = vadd.f32 %v1247_v14, %v642_v16  ;;  %v1523_v14 = vld [vmem:[%s2392_s13 + $0x48] sm:$0xff]   ;;  %v1524_v15 = vld [vmem:[%s2392_s13 + $0x50] sm:$0xff]   ;;  %v1525_v16 = vld [vmem:[%s2392_s13 + $0x58] sm:$0xff]  }
 0x44a   :  { %v651_v19 = vpack.c.bf16 %v650_v18, %v649_v17  ;;  %v1526_v17 = vld [vmem:[%s2392_s13 + $0x60] sm:$0xff]   ;;  %v1527_v18 = vld [vmem:[%s2392_s13 + $0x68] sm:$0xff]  }
 0x44c   :  { %1413 = vmatmul.mubr.bf16.vlgmr.msra.gmra.mrb[4].mxu1 %v651_v19  ;;  %v1528_v19 = vld [vmem:[%s2392_s13 + $0x70] sm:$0xff]  }
 0x44d   :  { %1464 = vmatprep.mubr.msk.bf16.mxu1 %vm1909_vm0, %v1908_v0  ;;  %1449 = vmatpush3.bf16.msra.mxu1 %v1522_v13 }
 0x44e   :  { %1450 = vmatprep.subr.bf16.mxu1 %v1908_v0 }
 0x451   :  { %1451 = vmatpush3.bf16.msra.mxu1 %v1523_v14 }
 0x452   :  { %1452 = vmatprep.subr.bf16.mxu1 %v1908_v0 }
 0x455   :  { %1453 = vmatpush3.bf16.msra.mxu1 %v1524_v15 }
 0x456   :  { %1454 = vmatprep.subr.bf16.mxu1 %v1908_v0 }
 0x459   :  { %1455 = vmatpush3.bf16.msra.mxu1 %v1525_v16 }
 0x45a   :  { %1456 = vmatprep.subr.bf16.mxu1 %v1908_v0 }
 0x45d   :  { %1457 = vmatpush3.bf16.msra.mxu1 %v1526_v17  ;;  %v1297_v17 = vld [vmem:[#allocation22] ss:$0 sm:$0xff] }
 0x45e   :  { %1458 = vmatprep.subr.bf16.mxu1 %v1908_v0 }
 0x461   :  { %1459 = vmatpush3.bf16.msra.mxu1 %v1527_v18 }
 0x462   :  { %1460 = vmatprep.subr.bf16.mxu1 %v1908_v0 }
 0x465   :  { %1461 = vmatpush3.bf16.msra.mxu1 %v1528_v19  ;;  %v1298_v19 = vld [vmem:[#allocation23] ss:$0 sm:$0xff] }
 0x466   :  { %1462 = vmatprep.subr.bf16.mxu1 %v1908_v0 }
 0x51f   :  { %v751_v20 = vpop.f32.mrb[4].mxu1 }
 0x520   :  { %v1414_v21 = vpop.f32.mrb[5].mxu1 }
 0x521   :  { %v754_v22 = vpop.f32.mrb[6].mxu1  ;;  %v1261_v21 = vld [vmem:[#allocation20] ss:$0 sm:$0xff] }
 0x522   :  { %v758_v23 = vpack.c.bf16 %v754_v22, %v751_v20  ;;  %v1415_v24 = vpop.f32.mrb[7].mxu1  ;;  %v1529_v20 = vld [vmem:[%s2392_s13 + $0x78] sm:$0xff]  }
 0x523   :  { %1463 = vmatpush3.bf16.msra.mxu1 %v1529_v20 }
 0x524   :  { %1417 = vmatpush3.bf16.msra.mxu0 %v758_v23 }
 0x525   :  { %1422 = vmatprep.subr.bf16.mxu0 %v1908_v0 }
 0x527   :  { %1419 = vmatmul.mubr.msk.bf16.vlgmr.msra.gmra.mrb[8].mxu0 %vm558_vm1, %v2271_v32  ;;  %v1514_v32 = vld [vmem:[%s2392_s13] sm:$0xff]   ;;  %s1910_s13 = smov [#allocation25]  }
 0x528   :  { %1424 = vmatprep.mubr.msk.bf16.mxu0 %vm1909_vm0, %v1908_v0  ;;  %s1206_s7 = sshll.u32 %s1910_s13, 4  ;;  %s1207_s7 = int_to_ptr.vmem [resolvable:$true] %s1206_s7 }
 0x529   :  { %s1850_s8 = scalar_lea.vmem %s1207_s7, 32  ;;  %p1855_p1 = scmp.lt.s32.totalorder %s1207_s7, %s1207_s7 }
 0x52a   :  { %p1851_p0 = scmp.ne.s32.totalorder %s1207_s7, %s1850_s8  ;;  %p1856_p2 = scmp.lt.s32.totalorder %s1850_s8, %s1850_s8 }
 0x52c   :  { %p1857_p3 = por %p1856_p2, %p1855_p1 }
 0x52e   :  { %p1858_p4 = pnand %p1857_p3, %p1851_p0 }
 0x5fa   :  { %v801_v26 = vpop.f32.mrb[8].mxu0 }
 0x5fb   :  { %v802_v27 = vadd.f32 %v1256_v25, %v801_v26  ;;  %v1420_v28 = vpop.f32.mrb[9].mxu0 }
 0x5fc   :  { %v804_v29 = vpop.f32.mrb[10].mxu0 }
 0x5fd   :  { %v808_v30 = vmax.f32 %v802_v27, 0.0  ;;  %v805_v31 = vadd.f32 %v1256_v25, %v804_v29  ;;  %v1421_v33 = vpop.f32.mrb[11].mxu0 }
 0x5ff   :  { %v809_v34 = vmax.f32 %v805_v31, 0.0  ;;  %v810_v35 = vadd.f32 %v808_v30, %v605_v50 }
 0x601   :  { %v811_v36 = vadd.f32 %v809_v34, %v606_v51 }
 0x603   :  { %v813_v37 = vpack.c.bf16 %v811_v36, %v810_v35 }
 0x605   :  { %1423 = vmatpush3.bf16.msra.mxu0 %v813_v37 }
 0x606   :  { %1428 = vmatprep.subr.bf16.mxu0 %v1908_v0 }
 0x608   :  { %1425 = vmatmul.mubr.msk.bf16.vlgmr.msra.gmra.mrb[12].mxu0 %vm558_vm1, %v812_v38 }
 0x609   :  { %1444 = vmatprep.mubr.msk.bf16.mxu0 %vm1909_vm0, %v1908_v0  ;;  %1429 = vmatpush3.bf16.msra.mxu0 %v1514_v32 }
 0x60a   :  { %1430 = vmatprep.subr.bf16.mxu0 %v1908_v0 }
 0x60d   :  { %1431 = vmatpush3.bf16.msra.mxu0 %v1515_v39 }
 0x60e   :  { %1432 = vmatprep.subr.bf16.mxu0 %v1908_v0 }
 0x611   :  { %1433 = vmatpush3.bf16.msra.mxu0 %v1516_v40 }
 0x612   :  { %1434 = vmatprep.subr.bf16.mxu0 %v1908_v0 }
 0x615   :  { %1435 = vmatpush3.bf16.msra.mxu0 %v1517_v41 }
 0x616   :  { %1436 = vmatprep.subr.bf16.mxu0 %v1908_v0 }
 0x619   :  { %1437 = vmatpush3.bf16.msra.mxu0 %v1518_v42 }
 0x61a   :  { %1438 = vmatprep.subr.bf16.mxu0 %v1908_v0 }
 0x61d   :  { %1439 = vmatpush3.bf16.msra.mxu0 %v1519_v43 }
 0x61e   :  { %1440 = vmatprep.subr.bf16.mxu0 %v1908_v0 }
 0x621   :  { %1441 = vmatpush3.bf16.msra.mxu0 %v1520_v44 }
 0x622   :  { %1442 = vmatprep.subr.bf16.mxu0 %v1908_v0 }
 0x625   :  { %1443 = vmatpush3.bf16.msra.mxu0 %v1521_v45 }
 0x6db   :  { %v851_v46 = vpop.f32.mrb[12].mxu0 }
 0x6dc   :  { %v860_v47 = vsel %vm859_vm2, %v851_v46, 0.0  ;;  %v1426_v48 = vpop.f32.mrb[13].mxu0 }
 0x6dd   :  { %v861_v49 = vrot.slane %v860_v47, 4  ;;  %v854_v50 = vpop.f32.mrb[14].mxu0 }
 0x6de   :  { %v1427_v51 = vpop.f32.mrb[15].mxu0 }
 0x6df   :  { %v862_v52 = vadd.f32 %v861_v49, %v860_v47  ;;  %v1270_v47 = vld [vmem:[#allocation17 + $0x1] ss:$0 sm:$0xff]  ;;  %v1271_v49 = vld [vmem:[#allocation19 + $0x1] ss:$0 sm:$0xff] }
 0x6e1   :  { %v863_v53 = vrot.slane %v862_v52, 2 }
 0x6e3   :  { %v864_v54 = vadd.f32 %v863_v53, %v862_v52  ;;  %v1288_v53 = vld [vmem:[#allocation20 + $0x1] ss:$0 sm:$0xff] }
 0x6e5   :  { %v865_v55 = vrot.slane %v864_v54, 1 }
 0x6e7   :  { %v866_v56 = vadd.f32 %v865_v55, %v864_v54 }
 0x6e9   :  { %v867_v59 = vmul.f32 0.5, %v866_v56 }
 0x6eb   :  { %v868_v60 = vsub.f32 %v851_v46, %v867_v59 }
 0x6ed   :  { %v869_v61 = vmul.f32 %v868_v60, %v868_v60 }
 0x6ef   :  { %v870_v62 = vsel %vm859_vm2, %v869_v61, 0.0 }
 0x6f0   :  { %v871_v63 = vrot.slane %v870_v62, 4 }
 0x6f2   :  { %v872_v1 = vadd.f32 %v871_v63, %v870_v62 }
 0x6f4   :  { %v873_v2 = vrot.slane %v872_v1, 2 }
 0x6f6   :  { %v874_v3 = vadd.f32 %v873_v2, %v872_v1 }
 0x6f8   :  { %v875_v4 = vrot.slane %v874_v3, 1 }
 0x6fa   :  { %v876_v5 = vadd.f32 %v875_v4, %v874_v3 }
 0x6fc   :  { %v877_v6 = vmul.f32 0.5, %v876_v5 }
 0x6fe   :  { %v878_v7 = vadd.f32 1e-05, %v877_v6 }
 0x700   :  { %1536 = vrsqrt.f32 %v878_v7 }
 0x70a   :  { %v1537_v57 = vpop.eup %1536 }
 0x70b   :  { %v880_v58 = vmul.f32 %v1537_v57, %v868_v60 }
 0x70d   :  { %v887_v10 = vmul.f32 %v1259_v8, %v880_v58 }
 0x70f   :  { %v894_v11 = vadd.f32 %v1260_v9, %v887_v10 }
 0x711   :  { %v895_v12 = vpack.c.bf16 %v894_v11, %v894_v11 }
 0x713   :  { %1445 = vmatmul.mubr.bf16.vlgmr.msra.gmra.mrb[16].mxu0 %v895_v12 }
 0x7e6   :  { %v1001_v22 = vpop.f32.mrb[16].mxu0 }
 0x7e7   :  { %v1002_v23 = vadd.f32 %v1261_v21, %v1001_v22  ;;  %v1446_v24 = vpop.f32.mrb[17].mxu0 }
 0x7e8   :  { %v1004_v25 = vpop.f32.mrb[18].mxu0 }
 0x7e9   :  { %v1007_v26 = vmax.f32 %v1002_v23, 0.0  ;;  %v1447_v27 = vpop.f32.mrb[19].mxu0 }
 0x7eb   :  { %v1012_v28 = vsel %vm859_vm2, %v1007_v26, 0.0 }
 0x7ec   :  { %v1013_v29 = vrot.slane %v1012_v28, 4 }
 0x7ee   :  { %v1014_v30 = vadd.f32 %v1013_v29, %v1012_v28 }
 0x7f0   :  { %v1015_v31 = vrot.slane %v1014_v30, 2 }
 0x7f2   :  { %v1016_v33 = vadd.f32 %v1015_v31, %v1014_v30 }
 0x7f4   :  { %v1017_v34 = vrot.slane %v1016_v33, 1 }
 0x7f6   :  { %v1018_v0 = vadd.f32 %v1017_v34, %v1016_v33 }
 0x7f8   :  { %v1019_v35 = vmul.f32 0.5, %v1018_v0 }
 0x7fa   :  { %v1020_v36 = vsub.f32 %v1007_v26, %v1019_v35 }
 0x7fc   :  { %v1021_v37 = vmul.f32 %v1020_v36, %v1020_v36 }
 0x7fe   :  { %v1022_v38 = vsel %vm859_vm2, %v1021_v37, 0.0 }
 0x7ff   :  { %v1023_v32 = vrot.slane %v1022_v38, 4 }
 0x801   :  { %v1024_v39 = vadd.f32 %v1023_v32, %v1022_v38 }
 0x803   :  { %v1025_v40 = vrot.slane %v1024_v39, 2 }
 0x805   :  { %v1026_v41 = vadd.f32 %v1025_v40, %v1024_v39 }
 0x807   :  { %v1027_v42 = vrot.slane %v1026_v41, 1 }
 0x809   :  { %v1028_v43 = vadd.f32 %v1027_v42, %v1026_v41 }
 0x80b   :  { %v1029_v44 = vmul.f32 0.5, %v1028_v43 }
 0x80d   :  { %v1030_v45 = vadd.f32 1e-05, %v1029_v44 }
 0x80f   :  { %1538 = vrsqrt.f32 %v1030_v45 }
 0x819   :  { %v1539_v46 = vpop.eup %1538 }
 0x81a   :  { %v1032_v48 = vmul.f32 %v1539_v46, %v1020_v36 }
 0x81c   :  { %v1039_v50 = vmul.f32 %v1270_v47, %v1032_v48 }
 0x81e   :  { %v1046_v51 = vadd.f32 %v1271_v49, %v1039_v50 }
 0x820   :  { %v1047_v52 = vpack.c.bf16 %v1046_v51, %v1046_v51 }
 0x822   :  { %1465 = vmatmul.mubr.bf16.vlgmr.msra.gmra.mrb[8].mxu1 %v1047_v52 }
 0x8f5   :  { %v1155_v54 = vpop.f32.mrb[8].mxu1 }
 0x8f6   :  { %v1156_v55 = vadd.f32 %v1288_v53, %v1155_v54  ;;  %v1466_v56 = vpop.f32.mrb[9].mxu1 }
 0x8f7   :  { %v1158_v59 = vpop.f32.mrb[10].mxu1 }
 0x8f8   :  { %v1161_v60 = vmax.f32 %v1156_v55, 0.0  ;;  %v1467_v61 = vpop.f32.mrb[11].mxu1 }
 0x8fa   :  { %v1164_v62 = vsel %vm859_vm2, %v1161_v60, 0.0 }
 0x8fb   :  { %v1165_v63 = vrot.slane %v1164_v62, 4 }
 0x8fd   :  { %v1166_v1 = vadd.f32 %v1165_v63, %v1164_v62 }
 0x8ff   :  { %v1167_v2 = vrot.slane %v1166_v1, 2 }
 0x901   :  { %v1168_v3 = vadd.f32 %v1167_v2, %v1166_v1 }
 0x903   :  { %v1169_v4 = vrot.slane %v1168_v3, 1 }
 0x905   :  { %v1170_v5 = vadd.f32 %v1169_v4, %v1168_v3 }
 0x907   :  { %v1171_v6 = vmul.f32 0.5, %v1170_v5 }
 0x909   :  { %v1172_v7 = vsub.f32 %v1161_v60, %v1171_v6 }
 0x90b   :  { %v1173_v57 = vmul.f32 %v1172_v7, %v1172_v7 }
 0x90d   :  { %v1174_v8 = vsel %vm859_vm2, %v1173_v57, 0.0 }
 0x90e   :  { %v1175_v58 = vrot.slane %v1174_v8, 4 }
 0x910   :  { %v1176_v9 = vadd.f32 %v1175_v58, %v1174_v8 }
 0x912   :  { %v1177_v10 = vrot.slane %v1176_v9, 2 }
 0x914   :  { %v1178_v11 = vadd.f32 %v1177_v10, %v1176_v9 }
 0x916   :  { %v1179_v12 = vrot.slane %v1178_v11, 1 }
 0x918   :  { %v1180_v13 = vadd.f32 %v1179_v12, %v1178_v11 }
 0x91a   :  { %v1181_v14 = vmul.f32 0.5, %v1180_v13 }
 0x91c   :  { %v1182_v15 = vadd.f32 1e-05, %v1181_v14 }
 0x91e   :  { %1540 = vrsqrt.f32 %v1182_v15 }
 0x928   :  { %v1541_v16 = vpop.eup %1540 }
 0x929   :  { %v1184_v18 = vmul.f32 %v1541_v16, %v1172_v7 }
 0x92b   :  { %v1191_v20 = vmul.f32 %v1297_v17, %v1184_v18 }
 0x92d   :  { %v1198_v21 = vadd.f32 %v1298_v19, %v1191_v20 }
 0x92f   :  { %1199 = vst [vmem:[#allocation25] sm:$0x3] %v1198_v21 }
 0x930   :  { %1861 = shalt.err (!%p1858_p4)
}
 0x931   :  { %s1862_s12 = scalar_lea.hbm %s2396_s17, 32 }
 0x932   :  { %p1863_p5 = scmp.ne.s32.totalorder %s2396_s17, %s1862_s12  ;;  %p1866_p6 = scmp.lt.u32.totalorder %s1862_s12, %s2396_s17 }
 0x934   :  { %p1868_p7 = pnand %p1866_p6, %p1863_p5 }
 0x936   :  { %1871 = shalt.err (!%p1868_p7)
}
 0x937   :  { %1209 = dma.vmem_to_hbm [thread:$0]  %s1207_s7, 32, %s2396_s17, [#allocation4]  }
 0x938   :  { %1888 = dma.done.wait [#allocation4], 32  }
 0x939   :  { %1889 = vsyncadd [#allocation4], 4294967264 }
 0x93a   :  { %1213 = vsyncpa [#allocation3], 1 }
 0x93b   :  { %1214 = vsyncpa [#allocation6], 1 }
 0x93c   :  { %1215 = vsyncpa [#allocation9], 1 }
 0x93d   :  { %1216 = vsyncpa [#allocation12], 1 }
 0x93e   :  { %1217 = vsyncpa [#allocation15], 1 }
 0x93f   :  { %1218 = vsyncpa [#allocation18], 1 }
 0x940   :  { %1219 = vsyncpa [#allocation21], 1 }
 0x941   :  { %1220 = vsyncpa [#allocation24], 1 }
 0x942   :  { %1221 = vsyncpa [#allocation4], 1 }

</bundles_post_ra>
